<compile_context>
chip_gen: v7x
topology: tpu7x:2x2x1
jax: 0.10.0
libtpu: 0.0.40
codegen_flags: <defaults>
</compile_context>

<pallas_src>
import functools

import jax
import jax.numpy as jnp
import numpy as np
from jax import lax
from jax.experimental import pallas as pl
from jax.experimental.pallas import tpu as pltpu  # noqa: F401  (TPU backend)

D_MODEL = 32
NHEAD = 4
HEAD_DIM = D_MODEL // NHEAD
DIM_FF = 64
LN_EPS = 1e-5  # PyTorch nn.LayerNorm default

# ---- packed parameter slab layout (f32, shape (168, 128)) -------------------
# rows [0,32)   : self-attn  [Wq | Wk | Wv | Wo]   (stored (in, out); Wq pre-scaled)
# rows [32,64)  : cross-attn [Wq | Wk | Wv | Wo]   (Wq pre-scaled)
# rows [64,96)  : linear1 W  (D, FF)   in lanes [0, 64)
# rows [96,160) : linear2 W  (FF, D)   in lanes [0, 32)
# row 160       : self-attn  [bq | bk | bv | bo]   (bq pre-scaled)
# row 161       : cross-attn [bq | bk | bv | bo]   (bq pre-scaled)
# row 162       : [b1 (64) | b2 (32) | 0]
# row 163       : [ln1_g | ln1_b | ln2_g | ln2_b]
# row 164       : [ln3_g | ln3_b | 0]
# rows 165-167  : zero padding (sublane count multiple of 8)
ROW_SA_W, ROW_CA_W, ROW_W1, ROW_W2 = 0, 32, 64, 96
ROW_SA_B, ROW_CA_B, ROW_FF_B, ROW_LN12, ROW_LN3 = 160, 161, 162, 163, 164
N_ROWS, N_LANES = 168, 128


# ------------------------------- Pallas kernel -------------------------------
def decoder_layer_kernel(act_ref, p_ref, out_ref, *, L, S):
    D = D_MODEL
    F = DIM_FF
    B = act_ref.shape[1] // D
    BL, BS = B * L, B * S

    # --- parameter slab: static slices are cheap ------------------------------
    sa_W = p_ref[ROW_SA_W:ROW_SA_W + D, :]                   # (D, 4D)
    ca_W = p_ref[ROW_CA_W:ROW_CA_W + D, :]                   # (D, 4D)
    w1 = p_ref[ROW_W1:ROW_W1 + D, 0:F]                       # (D, F)
    w2 = p_ref[ROW_W2:ROW_W2 + F, 0:D]                       # (F, D)
    sa_b = p_ref[ROW_SA_B:ROW_SA_B + 1, :]                   # (1, 4D)
    ca_b = p_ref[ROW_CA_B:ROW_CA_B + 1, :]                   # (1, 4D)
    b1 = p_ref[ROW_FF_B:ROW_FF_B + 1, 0:F]                   # (1, F)
    b2 = p_ref[ROW_FF_B:ROW_FF_B + 1, F:F + D]               # (1, D)
    ln12 = p_ref[ROW_LN12:ROW_LN12 + 1, :]                   # (1, 128)
    ln3r = p_ref[ROW_LN3:ROW_LN3 + 1, :]                     # (1, 128)
    ln1_g, ln1_b = ln12[:, 0:D], ln12[:, D:2 * D]
    ln2_g, ln2_b = ln12[:, 2 * D:3 * D], ln12[:, 3 * D:4 * D]
    ln3_g, ln3_b = ln3r[:, 0:D], ln3r[:, D:2 * D]

    def dot(a, w):
        return jnp.dot(a, w, preferred_element_type=jnp.float32)

    def layernorm(z, g, beta):
        mu = jnp.mean(z, axis=-1, keepdims=True)
        var = jnp.mean((z - mu) ** 2, axis=-1, keepdims=True)
        return (z - mu) * lax.rsqrt(var + LN_EPS) * g + beta

    def unstack(slab):
        # (T, B*D) lane-packed -> (B*T, D) batch-major rows.  Lane slices only,
        # no cross-sublane gathers.
        return jnp.concatenate([slab[:, b * D:(b + 1) * D] for b in range(B)],
                               axis=0)

    def attention(q, k, v, tq, tk):
        # q: (B*tq, D); k, v: (B*tk, D) batch-major.  The 1/sqrt(head_dim)
        # scale is already folded into q (via Wq/bq at pack time).  All 2-D:
        # heads are lane slices; scores contract on the lane axis.
        outs = []
        for b in range(B):
            qb = q[b * tq:(b + 1) * tq, :]
            kb = k[b * tk:(b + 1) * tk, :]
            vb = v[b * tk:(b + 1) * tk, :]
            heads = []
            for h in range(NHEAD):
                lo, hi = h * HEAD_DIM, (h + 1) * HEAD_DIM
                s = lax.dot_general(qb[:, lo:hi], kb[:, lo:hi],
                                    (((1,), (1,)), ((), ())),
                                    preferred_element_type=jnp.float32)  # (tq, tk)
                s = s - jnp.max(s, axis=-1, keepdims=True)
                p = jnp.exp(s)
                p = p / jnp.sum(p, axis=-1, keepdims=True)   # exact divide
                heads.append(dot(p, vb[:, lo:hi]))           # (tq, HEAD_DIM)
            outs.append(jnp.concatenate(heads, axis=-1))     # (tq, D)
        return jnp.concatenate(outs, axis=0)                 # (B*tq, D)

    # --- activation slab rows: [tgt | query_pos | memory | pos] --------------
    tgt_s = act_ref[0:L, :]
    qpos_s = act_ref[L:2 * L, :]
    mem_s = act_ref[2 * L:2 * L + S, :]
    pos_s = act_ref[2 * L + S:2 * L + 2 * S, :]

    x = unstack(tgt_s)                        # (B*L, D) residual stream
    qpos = unstack(qpos_s)                    # (B*L, D)
    mem = unstack(mem_s)                      # (B*S, D)
    memp = mem + unstack(pos_s)               # memory + pos

    # ---- self-attention: q = k = tgt + query_pos, v = tgt -------------------
    xq = x + qpos
    proj = dot(jnp.concatenate([xq, x], axis=0), sa_W[:, 0:3 * D])  # one MXU push
    q = proj[0:BL, 0:D] + sa_b[:, 0:D]                      # Q pre-scaled
    k = proj[0:BL, D:2 * D] + sa_b[:, D:2 * D]
    v = proj[BL:2 * BL, 2 * D:3 * D] + sa_b[:, 2 * D:3 * D]
    a = attention(q, k, v, L, L)
    x = layernorm(x + dot(a, sa_W[:, 3 * D:4 * D]) + sa_b[:, 3 * D:4 * D],
                  ln1_g, ln1_b)

    # ---- cross-attention: q = x+query_pos, k = memory+pos, v = memory -------
    proj = dot(jnp.concatenate([x + qpos, memp, mem], axis=0), ca_W[:, 0:3 * D])
    q = proj[0:BL, 0:D] + ca_b[:, 0:D]                      # Q pre-scaled
    k = proj[BL:BL + BS, D:2 * D] + ca_b[:, D:2 * D]
    v = proj[BL + BS:BL + 2 * BS, 2 * D:3 * D] + ca_b[:, 2 * D:3 * D]
    a = attention(q, k, v, L, S)
    x = layernorm(x + dot(a, ca_W[:, 3 * D:4 * D]) + ca_b[:, 3 * D:4 * D],
                  ln2_g, ln2_b)

    # ---- feed-forward: linear2(relu(linear1(x)))  (dropout = identity) ------
    h = jnp.maximum(dot(x, w1) + b1, 0.0)
    x = layernorm(x + dot(h, w2) + b2, ln3_g, ln3_b)

    # ---- lane-packed output: (L, B*D); row-major == seq-first (L, B, D) -----
    out_ref[...] = jnp.concatenate(
        [x[b * L:(b + 1) * L, :] for b in range(B)], axis=-1)


# --------------------------------- wrapper -----------------------------------
def transformer_decoder_layer(tgt, memory, pos, query_pos, packed_params):
    """tgt/query_pos: (L, B, D); memory/pos: (S, B, D); returns (L, B, D)."""
    L, B, D = tgt.shape
    S = memory.shape[0]
    F = DIM_FF

    # One lane-packed activation slab -> one input DMA.  The (T, B, D) ->
    # (T, B*D) reshapes are free row-major views; no transposes anywhere.
    act = jnp.concatenate([tgt.reshape(L, B * D),
                           query_pos.reshape(L, B * D),
                           memory.reshape(S, B * D),
                           pos.reshape(S, B * D)], axis=0)   # (2L+2S, B*D)

    flops = (2 * (2 * B * L) * D * (3 * D)                 # SA fused Q|K|V proj
             + 2 * B * L * D * D                           # SA out proj
             + 4 * B * L * L * D                           # SA attention
             + 2 * (B * L + 2 * B * S) * D * (3 * D)       # CA fused proj
             + 2 * B * L * D * D                           # CA out proj
             + 4 * B * L * S * D                           # CA attention
             + 2 * B * L * D * F + 2 * B * L * F * D)      # FFN
    cost = pl.CostEstimate(
        flops=int(flops),
        transcendentals=int(B * NHEAD * L * (L + S)),
        bytes_accessed=int(4 * (act.size + packed_params.size + L * B * D)))

    kernel = functools.partial(decoder_layer_kernel, L=L, S=S)
    out = pl.pallas_call(
        kernel,
        out_shape=jax.ShapeDtypeStruct((L, B * D), jnp.float32),
        cost_estimate=cost,
    )(act, packed_params)
    # free row-major reshape back to the seq-first (L, B, D) layout
    return out.reshape(L, B, D)


# ------------------------------ parameter packing ----------------------------
def pack_params(weights):
    (sa_wq, sa_wk, sa_wv, sa_wo, sa_bq, sa_bk, sa_bv, sa_bo,
     ca_wq, ca_wk, ca_wv, ca_wo, ca_bq, ca_bk, ca_bv, ca_bo,
     w1, b1, w2, b2,
     ln1_g, ln1_b, ln2_g, ln2_b, ln3_g, ln3_b) = weights

    # fold the softmax scale into the Q projection (weights + bias)
    scale = jnp.float32(1.0 / np.sqrt(HEAD_DIM))

    def z(r, c):
        return jnp.zeros((r, c), jnp.float32)

    rows = [
        jnp.concatenate([sa_wq * scale, sa_wk, sa_wv, sa_wo], axis=1),   # 32x128
        jnp.concatenate([ca_wq * scale, ca_wk, ca_wv, ca_wo], axis=1),   # 32x128
        jnp.concatenate([w1, z(D_MODEL, N_LANES - DIM_FF)], axis=1),     # 32x128
        jnp.concatenate([w2, z(DIM_FF, N_LANES - D_MODEL)], axis=1),     # 64x128
        jnp.concatenate([sa_bq * scale, sa_bk, sa_bv, sa_bo], axis=1),   # 1x128
        jnp.concatenate([ca_bq * scale, ca_bk, ca_bv, ca_bo], axis=1),   # 1x128
        jnp.concatenate([b1, b2, z(1, N_LANES - DIM_FF - D_MODEL)], axis=1),
        jnp.concatenate([ln1_g, ln1_b, ln2_g, ln2_b], axis=1),
        jnp.concatenate([ln3_g, ln3_b, z(1, N_LANES - 2 * D_MODEL)], axis=1),
        z(3, N_LANES),
    ]
    packed = jnp.concatenate(rows, axis=0)
    assert packed.shape == (N_ROWS, N_LANES)
    return packed


# ------------------------------ pure-JAX reference ---------------------------
def _mha(q_in, k_in, v_in, wq, bq, wk, bk, wv, bv, wo, bo):
    Lq = q_in.shape[0]
    Lk = k_in.shape[0]
    q = jnp.dot(q_in, wq) + bq
    k = jnp.dot(k_in, wk) + bk
    v = jnp.dot(v_in, wv) + bv
    qh = q.reshape(Lq, NHEAD, HEAD_DIM)
    kh = k.reshape(Lk, NHEAD, HEAD_DIM)
    vh = v.reshape(Lk, NHEAD, HEAD_DIM)
    scale = 1.0 / jnp.sqrt(jnp.float32(HEAD_DIM))
    scores = jnp.einsum('qhd,khd->hqk', qh, kh) * scale
    scores = scores - jnp.max(scores, axis=-1, keepdims=True)
    p = jnp.exp(scores)
    attn = p / jnp.sum(p, axis=-1, keepdims=True)
    out = jnp.einsum('hqk,khd->qhd', attn, vh).reshape(Lq, D_MODEL)
    return jnp.dot(out, wo) + bo


def _layernorm(x, g, b):
    mu = jnp.mean(x, axis=-1, keepdims=True)
    var = jnp.mean((x - mu) ** 2, axis=-1, keepdims=True)
    return (x - mu) * jax.lax.rsqrt(var + LN_EPS) * g + b


def _decoder_body(x, mem, qpos, mpos, W):
    (sa_wq, sa_wk, sa_wv, sa_wo, sa_bq, sa_bk, sa_bv, sa_bo,
     ca_wq, ca_wk, ca_wv, ca_wo, ca_bq, ca_bk, ca_bv, ca_bo,
     w1, b1, w2, b2,
     ln1_g, ln1_b, ln2_g, ln2_b, ln3_g, ln3_b) = W
    qk = x + qpos
    sa = _mha(qk, qk, x, sa_wq, sa_bq, sa_wk, sa_bk, sa_wv, sa_bv, sa_wo, sa_bo)
    x = _layernorm(x + sa, ln1_g, ln1_b)
    ca = _mha(x + qpos, mem + mpos, mem,
              ca_wq, ca_bq, ca_wk, ca_bk, ca_wv, ca_bv, ca_wo, ca_bo)
    x = _layernorm(x + ca, ln2_g, ln2_b)
    h = jnp.maximum(jnp.dot(x, w1) + b1, 0.0)
    ff = jnp.dot(h, w2) + b2
    return _layernorm(x + ff, ln3_g, ln3_b)


def reference(tgt, memory, pos, query_pos, weights):
    xb = jnp.transpose(tgt, (1, 0, 2))
    memb = jnp.transpose(memory, (1, 0, 2))
    qposb = jnp.transpose(query_pos, (1, 0, 2))
    posb = jnp.transpose(pos, (1, 0, 2))
    out = jax.vmap(lambda x, m, qp, mp: _decoder_body(x, m, qp, mp, weights))(
        xb, memb, qposb, posb)
    return jnp.transpose(out, (1, 0, 2))


# ------------------------------ parameter init -------------------------------
def init_params(key):
    ks = iter(jax.random.split(key, 32))

    def w(shape, scale=0.1):
        return jax.random.normal(next(ks), shape, jnp.float32) * scale

    def attn_params():
        # weights stored (in, out) so the kernel does x @ W; biases are (1, out)
        return (w((D_MODEL, D_MODEL)), w((D_MODEL, D_MODEL)),
                w((D_MODEL, D_MODEL)), w((D_MODEL, D_MODEL)),
                w((1, D_MODEL)), w((1, D_MODEL)), w((1, D_MODEL)), w((1, D_MODEL)))

    sa = attn_params()
    ca = attn_params()
    ffn = (w((D_MODEL, DIM_FF)), w((1, DIM_FF)), w((DIM_FF, D_MODEL)), w((1, D_MODEL)))
    lns = (jnp.ones((1, D_MODEL), jnp.float32), jnp.zeros((1, D_MODEL), jnp.float32),
           jnp.ones((1, D_MODEL), jnp.float32), jnp.zeros((1, D_MODEL), jnp.float32),
           jnp.ones((1, D_MODEL), jnp.float32), jnp.zeros((1, D_MODEL), jnp.float32))
    return sa + ca + ffn + lns


if __name__ == "__main__":
    # small shapes consistent with the decoder layer: num_queries=8, num_keys=16,
    # batch=2, d_model=32, nhead=4, dim_feedforward=64
    L, S, B = 8, 16, 2
    key = jax.random.PRNGKey(0)
    k1, k2, k3, k4, kp = jax.random.split(key, 5)
    tgt = jax.random.normal(k1, (L, B, D_MODEL), jnp.float32)
    memory = jax.random.normal(k2, (S, B, D_MODEL), jnp.float32)
    query_pos = jax.random.normal(k3, (L, B, D_MODEL), jnp.float32)
    pos = jax.random.normal(k4, (S, B, D_MODEL), jnp.float32)
    weights = init_params(kp)
    packed = pack_params(weights)

    out = transformer_decoder_layer(tgt, memory, pos, query_pos, packed)
    jax.block_until_ready(out)

    ref = reference(tgt, memory, pos, query_pos, weights)
    assert out.shape == (L, B, D_MODEL)
    np.testing.assert_allclose(np.asarray(out), np.asarray(ref),
                               rtol=1e-4, atol=1e-4)
    print("KERNEL_OK")
</pallas_src>

<mosaic_0001>
module attributes {stable_mosaic.version = 11 : i64} {
  func.func @decoder_layer_kernel(%arg0: memref<48x64xf32, #tpu.memory_space<vmem>>, %arg1: memref<168x128xf32, #tpu.memory_space<vmem>>, %arg2: memref<8x64xf32, #tpu.memory_space<vmem>>) attributes {dimension_semantics = [], scalar_prefetch = 0 : i64, scratch_operands = 0 : i64, tpu.core_type = #tpu.core_type<tc>} {
    %c0 = arith.constant 0 : index
    %c0_0 = arith.constant 0 : index
    %0 = vector.load %arg1[%c0, %c0_0] : memref<168x128xf32, #tpu.memory_space<vmem>>, vector<32x128xf32>
    %c32 = arith.constant 32 : index
    %c0_1 = arith.constant 0 : index
    %1 = vector.load %arg1[%c32, %c0_1] : memref<168x128xf32, #tpu.memory_space<vmem>>, vector<32x128xf32>
    %c64 = arith.constant 64 : index
    %c0_2 = arith.constant 0 : index
    %2 = vector.load %arg1[%c64, %c0_2] : memref<168x128xf32, #tpu.memory_space<vmem>>, vector<32x64xf32>
    %c96 = arith.constant 96 : index
    %c0_3 = arith.constant 0 : index
    %3 = vector.load %arg1[%c96, %c0_3] : memref<168x128xf32, #tpu.memory_space<vmem>>, vector<64x32xf32>
    %c160 = arith.constant 160 : index
    %c0_4 = arith.constant 0 : index
    %4 = vector.load %arg1[%c160, %c0_4] : memref<168x128xf32, #tpu.memory_space<vmem>>, vector<1x128xf32>
    %c161 = arith.constant 161 : index
    %c0_5 = arith.constant 0 : index
    %5 = vector.load %arg1[%c161, %c0_5] : memref<168x128xf32, #tpu.memory_space<vmem>>, vector<1x128xf32>
    %c162 = arith.constant 162 : index
    %c0_6 = arith.constant 0 : index
    %6 = vector.load %arg1[%c162, %c0_6] : memref<168x128xf32, #tpu.memory_space<vmem>>, vector<1x64xf32>
    %c162_7 = arith.constant 162 : index
    %c64_8 = arith.constant 64 : index
    %7 = vector.load %arg1[%c162_7, %c64_8] : memref<168x128xf32, #tpu.memory_space<vmem>>, vector<1x32xf32>
    %c163 = arith.constant 163 : index
    %c0_9 = arith.constant 0 : index
    %8 = vector.load %arg1[%c163, %c0_9] : memref<168x128xf32, #tpu.memory_space<vmem>>, vector<1x128xf32>
    %c164 = arith.constant 164 : index
    %c0_10 = arith.constant 0 : index
    %9 = vector.load %arg1[%c164, %c0_10] : memref<168x128xf32, #tpu.memory_space<vmem>>, vector<1x128xf32>
    %10 = vector.extract_strided_slice %8 {offsets = [0, 0], sizes = [1, 32], strides = [1, 1]} : vector<1x128xf32> to vector<1x32xf32>
    %11 = vector.extract_strided_slice %8 {offsets = [0, 32], sizes = [1, 32], strides = [1, 1]} : vector<1x128xf32> to vector<1x32xf32>
    %12 = vector.extract_strided_slice %8 {offsets = [0, 64], sizes = [1, 32], strides = [1, 1]} : vector<1x128xf32> to vector<1x32xf32>
    %13 = vector.extract_strided_slice %8 {offsets = [0, 96], sizes = [1, 32], strides = [1, 1]} : vector<1x128xf32> to vector<1x32xf32>
    %14 = vector.extract_strided_slice %9 {offsets = [0, 0], sizes = [1, 32], strides = [1, 1]} : vector<1x128xf32> to vector<1x32xf32>
    %15 = vector.extract_strided_slice %9 {offsets = [0, 32], sizes = [1, 32], strides = [1, 1]} : vector<1x128xf32> to vector<1x32xf32>
    %c0_11 = arith.constant 0 : index
    %c0_12 = arith.constant 0 : index
    %16 = vector.load %arg0[%c0_11, %c0_12] : memref<48x64xf32, #tpu.memory_space<vmem>>, vector<8x64xf32>
    %c8 = arith.constant 8 : index
    %c0_13 = arith.constant 0 : index
    %17 = vector.load %arg0[%c8, %c0_13] : memref<48x64xf32, #tpu.memory_space<vmem>>, vector<8x64xf32>
    %c16 = arith.constant 16 : index
    %c0_14 = arith.constant 0 : index
    %18 = vector.load %arg0[%c16, %c0_14] : memref<48x64xf32, #tpu.memory_space<vmem>>, vector<16x64xf32>
    %c32_15 = arith.constant 32 : index
    %c0_16 = arith.constant 0 : index
    %19 = vector.load %arg0[%c32_15, %c0_16] : memref<48x64xf32, #tpu.memory_space<vmem>>, vector<16x64xf32>
    %20 = vector.extract_strided_slice %16 {offsets = [0, 0], sizes = [8, 32], strides = [1, 1]} : vector<8x64xf32> to vector<8x32xf32>
    %21 = vector.extract_strided_slice %16 {offsets = [0, 32], sizes = [8, 32], strides = [1, 1]} : vector<8x64xf32> to vector<8x32xf32>
    %22 = tpu.concatenate %20, %21 in 0 : vector<8x32xf32>, vector<8x32xf32> -> vector<16x32xf32>
    %23 = vector.extract_strided_slice %17 {offsets = [0, 0], sizes = [8, 32], strides = [1, 1]} : vector<8x64xf32> to vector<8x32xf32>
    %24 = vector.extract_strided_slice %17 {offsets = [0, 32], sizes = [8, 32], strides = [1, 1]} : vector<8x64xf32> to vector<8x32xf32>
    %25 = tpu.concatenate %23, %24 in 0 : vector<8x32xf32>, vector<8x32xf32> -> vector<16x32xf32>
    %26 = vector.extract_strided_slice %18 {offsets = [0, 0], sizes = [16, 32], strides = [1, 1]} : vector<16x64xf32> to vector<16x32xf32>
    %27 = vector.extract_strided_slice %18 {offsets = [0, 32], sizes = [16, 32], strides = [1, 1]} : vector<16x64xf32> to vector<16x32xf32>
    %28 = tpu.concatenate %26, %27 in 0 : vector<16x32xf32>, vector<16x32xf32> -> vector<32x32xf32>
    %29 = vector.extract_strided_slice %19 {offsets = [0, 0], sizes = [16, 32], strides = [1, 1]} : vector<16x64xf32> to vector<16x32xf32>
    %30 = vector.extract_strided_slice %19 {offsets = [0, 32], sizes = [16, 32], strides = [1, 1]} : vector<16x64xf32> to vector<16x32xf32>
    %31 = tpu.concatenate %29, %30 in 0 : vector<16x32xf32>, vector<16x32xf32> -> vector<32x32xf32>
    %32 = arith.addf %28, %31 : vector<32x32xf32>
    %33 = arith.addf %22, %25 : vector<16x32xf32>
    %34 = tpu.concatenate %33, %22 in 0 : vector<16x32xf32>, vector<16x32xf32> -> vector<32x32xf32>
    %35 = vector.extract_strided_slice %0 {offsets = [0, 0], sizes = [32, 96], strides = [1, 1]} : vector<32x128xf32> to vector<32x96xf32>
    %cst = arith.constant dense<0.000000e+00> : vector<32x96xf32>
    %36 = tpu.matmul %34, %35, %cst {dimension_numbers = #tpu.dot_dimension_numbers<[1], [0], [0], [1], [0, 0, 1, 1], [], []>} : vector<32x32xf32>, vector<32x96xf32>, vector<32x96xf32> -> vector<32x96xf32>
    %37 = vector.extract_strided_slice %36 {offsets = [0, 0], sizes = [16, 32], strides = [1, 1]} : vector<32x96xf32> to vector<16x32xf32>
    %38 = vector.extract_strided_slice %4 {offsets = [0, 0], sizes = [1, 32], strides = [1, 1]} : vector<1x128xf32> to vector<1x32xf32>
    %39 = vector.broadcast %38 : vector<1x32xf32> to vector<16x32xf32>
    %40 = arith.addf %37, %39 : vector<16x32xf32>
    %41 = vector.extract_strided_slice %36 {offsets = [0, 32], sizes = [16, 32], strides = [1, 1]} : vector<32x96xf32> to vector<16x32xf32>
    %42 = vector.extract_strided_slice %4 {offsets = [0, 32], sizes = [1, 32], strides = [1, 1]} : vector<1x128xf32> to vector<1x32xf32>
    %43 = vector.broadcast %42 : vector<1x32xf32> to vector<16x32xf32>
    %44 = arith.addf %41, %43 : vector<16x32xf32>
    %45 = vector.extract_strided_slice %36 {offsets = [16, 64], sizes = [16, 32], strides = [1, 1]} : vector<32x96xf32> to vector<16x32xf32>
    %46 = vector.extract_strided_slice %4 {offsets = [0, 64], sizes = [1, 32], strides = [1, 1]} : vector<1x128xf32> to vector<1x32xf32>
    %47 = vector.broadcast %46 : vector<1x32xf32> to vector<16x32xf32>
    %48 = arith.addf %45, %47 : vector<16x32xf32>
    %49 = vector.extract_strided_slice %40 {offsets = [0, 0], sizes = [8, 32], strides = [1, 1]} : vector<16x32xf32> to vector<8x32xf32>
    %50 = vector.extract_strided_slice %44 {offsets = [0, 0], sizes = [8, 32], strides = [1, 1]} : vector<16x32xf32> to vector<8x32xf32>
    %51 = vector.extract_strided_slice %48 {offsets = [0, 0], sizes = [8, 32], strides = [1, 1]} : vector<16x32xf32> to vector<8x32xf32>
    %52 = vector.extract_strided_slice %49 {offsets = [0, 0], sizes = [8, 8], strides = [1, 1]} : vector<8x32xf32> to vector<8x8xf32>
    %53 = vector.extract_strided_slice %50 {offsets = [0, 0], sizes = [8, 8], strides = [1, 1]} : vector<8x32xf32> to vector<8x8xf32>
    %cst_17 = arith.constant dense<0.000000e+00> : vector<8x8xf32>
    %54 = tpu.matmul %52, %53, %cst_17 {dimension_numbers = #tpu.dot_dimension_numbers<[1], [1], [0], [0], [0, 0, 1, 0], [], []>} : vector<8x8xf32>, vector<8x8xf32>, vector<8x8xf32> -> vector<8x8xf32>
    %cst_18 = arith.constant dense<0xFF800000> : vector<8xf32>
    %55 = vector.multi_reduction <maximumf>, %54, %cst_18 [1] : vector<8x8xf32> to vector<8xf32>
    %56 = vector.shape_cast %55 : vector<8xf32> to vector<8x1xf32>
    %57 = vector.broadcast %56 : vector<8x1xf32> to vector<8x8xf32>
    %58 = arith.subf %54, %57 : vector<8x8xf32>
    %59 = math.exp %58 : vector<8x8xf32>
    %cst_19 = arith.constant dense<0.000000e+00> : vector<8xf32>
    %60 = vector.multi_reduction <add>, %59, %cst_19 [1] : vector<8x8xf32> to vector<8xf32>
    %61 = vector.shape_cast %60 : vector<8xf32> to vector<8x1xf32>
    %62 = vector.broadcast %61 : vector<8x1xf32> to vector<8x8xf32>
    %63 = arith.divf %59, %62 : vector<8x8xf32>
    %64 = vector.extract_strided_slice %51 {offsets = [0, 0], sizes = [8, 8], strides = [1, 1]} : vector<8x32xf32> to vector<8x8xf32>
    %cst_20 = arith.constant dense<0.000000e+00> : vector<8x8xf32>
    %65 = tpu.matmul %63, %64, %cst_20 {dimension_numbers = #tpu.dot_dimension_numbers<[1], [0], [0], [1], [0, 0, 1, 1], [], []>} : vector<8x8xf32>, vector<8x8xf32>, vector<8x8xf32> -> vector<8x8xf32>
    %66 = vector.extract_strided_slice %49 {offsets = [0, 8], sizes = [8, 8], strides = [1, 1]} : vector<8x32xf32> to vector<8x8xf32>
    %67 = vector.extract_strided_slice %50 {offsets = [0, 8], sizes = [8, 8], strides = [1, 1]} : vector<8x32xf32> to vector<8x8xf32>
    %cst_21 = arith.constant dense<0.000000e+00> : vector<8x8xf32>
    %68 = tpu.matmul %66, %67, %cst_21 {dimension_numbers = #tpu.dot_dimension_numbers<[1], [1], [0], [0], [0, 0, 1, 0], [], []>} : vector<8x8xf32>, vector<8x8xf32>, vector<8x8xf32> -> vector<8x8xf32>
    %cst_22 = arith.constant dense<0xFF800000> : vector<8xf32>
    %69 = vector.multi_reduction <maximumf>, %68, %cst_22 [1] : vector<8x8xf32> to vector<8xf32>
    %70 = vector.shape_cast %69 : vector<8xf32> to vector<8x1xf32>
    %71 = vector.broadcast %70 : vector<8x1xf32> to vector<8x8xf32>
    %72 = arith.subf %68, %71 : vector<8x8xf32>
    %73 = math.exp %72 : vector<8x8xf32>
    %cst_23 = arith.constant dense<0.000000e+00> : vector<8xf32>
    %74 = vector.multi_reduction <add>, %73, %cst_23 [1] : vector<8x8xf32> to vector<8xf32>
    %75 = vector.shape_cast %74 : vector<8xf32> to vector<8x1xf32>
    %76 = vector.broadcast %75 : vector<8x1xf32> to vector<8x8xf32>
    %77 = arith.divf %73, %76 : vector<8x8xf32>
    %78 = vector.extract_strided_slice %51 {offsets = [0, 8], sizes = [8, 8], strides = [1, 1]} : vector<8x32xf32> to vector<8x8xf32>
    %cst_24 = arith.constant dense<0.000000e+00> : vector<8x8xf32>
    %79 = tpu.matmul %77, %78, %cst_24 {dimension_numbers = #tpu.dot_dimension_numbers<[1], [0], [0], [1], [0, 0, 1, 1], [], []>} : vector<8x8xf32>, vector<8x8xf32>, vector<8x8xf32> -> vector<8x8xf32>
    %80 = vector.extract_strided_slice %49 {offsets = [0, 16], sizes = [8, 8], strides = [1, 1]} : vector<8x32xf32> to vector<8x8xf32>
    %81 = vector.extract_strided_slice %50 {offsets = [0, 16], sizes = [8, 8], strides = [1, 1]} : vector<8x32xf32> to vector<8x8xf32>
    %cst_25 = arith.constant dense<0.000000e+00> : vector<8x8xf32>
    %82 = tpu.matmul %80, %81, %cst_25 {dimension_numbers = #tpu.dot_dimension_numbers<[1], [1], [0], [0], [0, 0, 1, 0], [], []>} : vector<8x8xf32>, vector<8x8xf32>, vector<8x8xf32> -> vector<8x8xf32>
    %cst_26 = arith.constant dense<0xFF800000> : vector<8xf32>
    %83 = vector.multi_reduction <maximumf>, %82, %cst_26 [1] : vector<8x8xf32> to vector<8xf32>
    %84 = vector.shape_cast %83 : vector<8xf32> to vector<8x1xf32>
    %85 = vector.broadcast %84 : vector<8x1xf32> to vector<8x8xf32>
    %86 = arith.subf %82, %85 : vector<8x8xf32>
    %87 = math.exp %86 : vector<8x8xf32>
    %cst_27 = arith.constant dense<0.000000e+00> : vector<8xf32>
    %88 = vector.multi_reduction <add>, %87, %cst_27 [1] : vector<8x8xf32> to vector<8xf32>
    %89 = vector.shape_cast %88 : vector<8xf32> to vector<8x1xf32>
    %90 = vector.broadcast %89 : vector<8x1xf32> to vector<8x8xf32>
    %91 = arith.divf %87, %90 : vector<8x8xf32>
    %92 = vector.extract_strided_slice %51 {offsets = [0, 16], sizes = [8, 8], strides = [1, 1]} : vector<8x32xf32> to vector<8x8xf32>
    %cst_28 = arith.constant dense<0.000000e+00> : vector<8x8xf32>
    %93 = tpu.matmul %91, %92, %cst_28 {dimension_numbers = #tpu.dot_dimension_numbers<[1], [0], [0], [1], [0, 0, 1, 1], [], []>} : vector<8x8xf32>, vector<8x8xf32>, vector<8x8xf32> -> vector<8x8xf32>
    %94 = vector.extract_strided_slice %49 {offsets = [0, 24], sizes = [8, 8], strides = [1, 1]} : vector<8x32xf32> to vector<8x8xf32>
    %95 = vector.extract_strided_slice %50 {offsets = [0, 24], sizes = [8, 8], strides = [1, 1]} : vector<8x32xf32> to vector<8x8xf32>
    %cst_29 = arith.constant dense<0.000000e+00> : vector<8x8xf32>
    %96 = tpu.matmul %94, %95, %cst_29 {dimension_numbers = #tpu.dot_dimension_numbers<[1], [1], [0], [0], [0, 0, 1, 0], [], []>} : vector<8x8xf32>, vector<8x8xf32>, vector<8x8xf32> -> vector<8x8xf32>
    %cst_30 = arith.constant dense<0xFF800000> : vector<8xf32>
    %97 = vector.multi_reduction <maximumf>, %96, %cst_30 [1] : vector<8x8xf32> to vector<8xf32>
    %98 = vector.shape_cast %97 : vector<8xf32> to vector<8x1xf32>
    %99 = vector.broadcast %98 : vector<8x1xf32> to vector<8x8xf32>
    %100 = arith.subf %96, %99 : vector<8x8xf32>
    %101 = math.exp %100 : vector<8x8xf32>
    %cst_31 = arith.constant dense<0.000000e+00> : vector<8xf32>
    %102 = vector.multi_reduction <add>, %101, %cst_31 [1] : vector<8x8xf32> to vector<8xf32>
    %103 = vector.shape_cast %102 : vector<8xf32> to vector<8x1xf32>
    %104 = vector.broadcast %103 : vector<8x1xf32> to vector<8x8xf32>
    %105 = arith.divf %101, %104 : vector<8x8xf32>
    %106 = vector.extract_strided_slice %51 {offsets = [0, 24], sizes = [8, 8], strides = [1, 1]} : vector<8x32xf32> to vector<8x8xf32>
    %cst_32 = arith.constant dense<0.000000e+00> : vector<8x8xf32>
    %107 = tpu.matmul %105, %106, %cst_32 {dimension_numbers = #tpu.dot_dimension_numbers<[1], [0], [0], [1], [0, 0, 1, 1], [], []>} : vector<8x8xf32>, vector<8x8xf32>, vector<8x8xf32> -> vector<8x8xf32>
    %108 = tpu.concatenate %65, %79, %93, %107 in 1 : vector<8x8xf32>, vector<8x8xf32>, vector<8x8xf32>, vector<8x8xf32> -> vector<8x32xf32>
    %109 = vector.extract_strided_slice %40 {offsets = [8, 0], sizes = [8, 32], strides = [1, 1]} : vector<16x32xf32> to vector<8x32xf32>
    %110 = vector.extract_strided_slice %44 {offsets = [8, 0], sizes = [8, 32], strides = [1, 1]} : vector<16x32xf32> to vector<8x32xf32>
    %111 = vector.extract_strided_slice %48 {offsets = [8, 0], sizes = [8, 32], strides = [1, 1]} : vector<16x32xf32> to vector<8x32xf32>
    %112 = vector.extract_strided_slice %109 {offsets = [0, 0], sizes = [8, 8], strides = [1, 1]} : vector<8x32xf32> to vector<8x8xf32>
    %113 = vector.extract_strided_slice %110 {offsets = [0, 0], sizes = [8, 8], strides = [1, 1]} : vector<8x32xf32> to vector<8x8xf32>
    %cst_33 = arith.constant dense<0.000000e+00> : vector<8x8xf32>
    %114 = tpu.matmul %112, %113, %cst_33 {dimension_numbers = #tpu.dot_dimension_numbers<[1], [1], [0], [0], [0, 0, 1, 0], [], []>} : vector<8x8xf32>, vector<8x8xf32>, vector<8x8xf32> -> vector<8x8xf32>
    %cst_34 = arith.constant dense<0xFF800000> : vector<8xf32>
    %115 = vector.multi_reduction <maximumf>, %114, %cst_34 [1] : vector<8x8xf32> to vector<8xf32>
    %116 = vector.shape_cast %115 : vector<8xf32> to vector<8x1xf32>
    %117 = vector.broadcast %116 : vector<8x1xf32> to vector<8x8xf32>
    %118 = arith.subf %114, %117 : vector<8x8xf32>
    %119 = math.exp %118 : vector<8x8xf32>
    %cst_35 = arith.constant dense<0.000000e+00> : vector<8xf32>
    %120 = vector.multi_reduction <add>, %119, %cst_35 [1] : vector<8x8xf32> to vector<8xf32>
    %121 = vector.shape_cast %120 : vector<8xf32> to vector<8x1xf32>
    %122 = vector.broadcast %121 : vector<8x1xf32> to vector<8x8xf32>
    %123 = arith.divf %119, %122 : vector<8x8xf32>
    %124 = vector.extract_strided_slice %111 {offsets = [0, 0], sizes = [8, 8], strides = [1, 1]} : vector<8x32xf32> to vector<8x8xf32>
    %cst_36 = arith.constant dense<0.000000e+00> : vector<8x8xf32>
    %125 = tpu.matmul %123, %124, %cst_36 {dimension_numbers = #tpu.dot_dimension_numbers<[1], [0], [0], [1], [0, 0, 1, 1], [], []>} : vector<8x8xf32>, vector<8x8xf32>, vector<8x8xf32> -> vector<8x8xf32>
    %126 = vector.extract_strided_slice %109 {offsets = [0, 8], sizes = [8, 8], strides = [1, 1]} : vector<8x32xf32> to vector<8x8xf32>
    %127 = vector.extract_strided_slice %110 {offsets = [0, 8], sizes = [8, 8], strides = [1, 1]} : vector<8x32xf32> to vector<8x8xf32>
    %cst_37 = arith.constant dense<0.000000e+00> : vector<8x8xf32>
    %128 = tpu.matmul %126, %127, %cst_37 {dimension_numbers = #tpu.dot_dimension_numbers<[1], [1], [0], [0], [0, 0, 1, 0], [], []>} : vector<8x8xf32>, vector<8x8xf32>, vector<8x8xf32> -> vector<8x8xf32>
    %cst_38 = arith.constant dense<0xFF800000> : vector<8xf32>
    %129 = vector.multi_reduction <maximumf>, %128, %cst_38 [1] : vector<8x8xf32> to vector<8xf32>
    %130 = vector.shape_cast %129 : vector<8xf32> to vector<8x1xf32>
    %131 = vector.broadcast %130 : vector<8x1xf32> to vector<8x8xf32>
    %132 = arith.subf %128, %131 : vector<8x8xf32>
    %133 = math.exp %132 : vector<8x8xf32>
    %cst_39 = arith.constant dense<0.000000e+00> : vector<8xf32>
    %134 = vector.multi_reduction <add>, %133, %cst_39 [1] : vector<8x8xf32> to vector<8xf32>
    %135 = vector.shape_cast %134 : vector<8xf32> to vector<8x1xf32>
    %136 = vector.broadcast %135 : vector<8x1xf32> to vector<8x8xf32>
    %137 = arith.divf %133, %136 : vector<8x8xf32>
    %138 = vector.extract_strided_slice %111 {offsets = [0, 8], sizes = [8, 8], strides = [1, 1]} : vector<8x32xf32> to vector<8x8xf32>
    %cst_40 = arith.constant dense<0.000000e+00> : vector<8x8xf32>
    %139 = tpu.matmul %137, %138, %cst_40 {dimension_numbers = #tpu.dot_dimension_numbers<[1], [0], [0], [1], [0, 0, 1, 1], [], []>} : vector<8x8xf32>, vector<8x8xf32>, vector<8x8xf32> -> vector<8x8xf32>
    %140 = vector.extract_strided_slice %109 {offsets = [0, 16], sizes = [8, 8], strides = [1, 1]} : vector<8x32xf32> to vector<8x8xf32>
    %141 = vector.extract_strided_slice %110 {offsets = [0, 16], sizes = [8, 8], strides = [1, 1]} : vector<8x32xf32> to vector<8x8xf32>
    %cst_41 = arith.constant dense<0.000000e+00> : vector<8x8xf32>
    %142 = tpu.matmul %140, %141, %cst_41 {dimension_numbers = #tpu.dot_dimension_numbers<[1], [1], [0], [0], [0, 0, 1, 0], [], []>} : vector<8x8xf32>, vector<8x8xf32>, vector<8x8xf32> -> vector<8x8xf32>
    %cst_42 = arith.constant dense<0xFF800000> : vector<8xf32>
    %143 = vector.multi_reduction <maximumf>, %142, %cst_42 [1] : vector<8x8xf32> to vector<8xf32>
    %144 = vector.shape_cast %143 : vector<8xf32> to vector<8x1xf32>
    %145 = vector.broadcast %144 : vector<8x1xf32> to vector<8x8xf32>
    %146 = arith.subf %142, %145 : vector<8x8xf32>
    %147 = math.exp %146 : vector<8x8xf32>
    %cst_43 = arith.constant dense<0.000000e+00> : vector<8xf32>
    %148 = vector.multi_reduction <add>, %147, %cst_43 [1] : vector<8x8xf32> to vector<8xf32>
    %149 = vector.shape_cast %148 : vector<8xf32> to vector<8x1xf32>
    %150 = vector.broadcast %149 : vector<8x1xf32> to vector<8x8xf32>
    %151 = arith.divf %147, %150 : vector<8x8xf32>
    %152 = vector.extract_strided_slice %111 {offsets = [0, 16], sizes = [8, 8], strides = [1, 1]} : vector<8x32xf32> to vector<8x8xf32>
    %cst_44 = arith.constant dense<0.000000e+00> : vector<8x8xf32>
    %153 = tpu.matmul %151, %152, %cst_44 {dimension_numbers = #tpu.dot_dimension_numbers<[1], [0], [0], [1], [0, 0, 1, 1], [], []>} : vector<8x8xf32>, vector<8x8xf32>, vector<8x8xf32> -> vector<8x8xf32>
    %154 = vector.extract_strided_slice %109 {offsets = [0, 24], sizes = [8, 8], strides = [1, 1]} : vector<8x32xf32> to vector<8x8xf32>
    %155 = vector.extract_strided_slice %110 {offsets = [0, 24], sizes = [8, 8], strides = [1, 1]} : vector<8x32xf32> to vector<8x8xf32>
    %cst_45 = arith.constant dense<0.000000e+00> : vector<8x8xf32>
    %156 = tpu.matmul %154, %155, %cst_45 {dimension_numbers = #tpu.dot_dimension_numbers<[1], [1], [0], [0], [0, 0, 1, 0], [], []>} : vector<8x8xf32>, vector<8x8xf32>, vector<8x8xf32> -> vector<8x8xf32>
    %cst_46 = arith.constant dense<0xFF800000> : vector<8xf32>
    %157 = vector.multi_reduction <maximumf>, %156, %cst_46 [1] : vector<8x8xf32> to vector<8xf32>
    %158 = vector.shape_cast %157 : vector<8xf32> to vector<8x1xf32>
    %159 = vector.broadcast %158 : vector<8x1xf32> to vector<8x8xf32>
    %160 = arith.subf %156, %159 : vector<8x8xf32>
    %161 = math.exp %160 : vector<8x8xf32>
    %cst_47 = arith.constant dense<0.000000e+00> : vector<8xf32>
    %162 = vector.multi_reduction <add>, %161, %cst_47 [1] : vector<8x8xf32> to vector<8xf32>
    %163 = vector.shape_cast %162 : vector<8xf32> to vector<8x1xf32>
    %164 = vector.broadcast %163 : vector<8x1xf32> to vector<8x8xf32>
    %165 = arith.divf %161, %164 : vector<8x8xf32>
    %166 = vector.extract_strided_slice %111 {offsets = [0, 24], sizes = [8, 8], strides = [1, 1]} : vector<8x32xf32> to vector<8x8xf32>
    %cst_48 = arith.constant dense<0.000000e+00> : vector<8x8xf32>
    %167 = tpu.matmul %165, %166, %cst_48 {dimension_numbers = #tpu.dot_dimension_numbers<[1], [0], [0], [1], [0, 0, 1, 1], [], []>} : vector<8x8xf32>, vector<8x8xf32>, vector<8x8xf32> -> vector<8x8xf32>
    %168 = tpu.concatenate %125, %139, %153, %167 in 1 : vector<8x8xf32>, vector<8x8xf32>, vector<8x8xf32>, vector<8x8xf32> -> vector<8x32xf32>
    %169 = tpu.concatenate %108, %168 in 0 : vector<8x32xf32>, vector<8x32xf32> -> vector<16x32xf32>
    %170 = vector.extract_strided_slice %0 {offsets = [0, 96], sizes = [32, 32], strides = [1, 1]} : vector<32x128xf32> to vector<32x32xf32>
    %cst_49 = arith.constant dense<0.000000e+00> : vector<16x32xf32>
    %171 = tpu.matmul %169, %170, %cst_49 {dimension_numbers = #tpu.dot_dimension_numbers<[1], [0], [0], [1], [0, 0, 1, 1], [], []>} : vector<16x32xf32>, vector<32x32xf32>, vector<16x32xf32> -> vector<16x32xf32>
    %172 = arith.addf %22, %171 : vector<16x32xf32>
    %173 = vector.extract_strided_slice %4 {offsets = [0, 96], sizes = [1, 32], strides = [1, 1]} : vector<1x128xf32> to vector<1x32xf32>
    %174 = vector.broadcast %173 : vector<1x32xf32> to vector<16x32xf32>
    %175 = arith.addf %172, %174 : vector<16x32xf32>
    %cst_50 = arith.constant dense<0.000000e+00> : vector<16xf32>
    %176 = vector.multi_reduction <add>, %175, %cst_50 [1] : vector<16x32xf32> to vector<16xf32>
    %177 = vector.shape_cast %176 : vector<16xf32> to vector<16x1xf32>
    %cst_51 = arith.constant 3.200000e+01 : f32
    %178 = vector.broadcast %cst_51 : f32 to vector<16x1xf32>
    %179 = arith.divf %177, %178 : vector<16x1xf32>
    %180 = vector.broadcast %179 : vector<16x1xf32> to vector<16x32xf32>
    %181 = arith.subf %175, %180 : vector<16x32xf32>
    %182 = arith.mulf %181, %181 : vector<16x32xf32>
    %cst_52 = arith.constant dense<0.000000e+00> : vector<16xf32>
    %183 = vector.multi_reduction <add>, %182, %cst_52 [1] : vector<16x32xf32> to vector<16xf32>
    %184 = vector.shape_cast %183 : vector<16xf32> to vector<16x1xf32>
    %cst_53 = arith.constant 3.200000e+01 : f32
    %185 = vector.broadcast %cst_53 : f32 to vector<16x1xf32>
    %186 = arith.divf %184, %185 : vector<16x1xf32>
    %187 = vector.broadcast %179 : vector<16x1xf32> to vector<16x32xf32>
    %188 = arith.subf %175, %187 : vector<16x32xf32>
    %cst_54 = arith.constant 9.99999974E-6 : f32
    %189 = vector.broadcast %cst_54 : f32 to vector<16x1xf32>
    %190 = arith.addf %186, %189 : vector<16x1xf32>
    %191 = math.rsqrt %190 : vector<16x1xf32>
    %192 = vector.broadcast %191 : vector<16x1xf32> to vector<16x32xf32>
    %193 = arith.mulf %188, %192 : vector<16x32xf32>
    %194 = vector.broadcast %10 : vector<1x32xf32> to vector<16x32xf32>
    %195 = arith.mulf %193, %194 : vector<16x32xf32>
    %196 = vector.broadcast %11 : vector<1x32xf32> to vector<16x32xf32>
    %197 = arith.addf %195, %196 : vector<16x32xf32>
    %198 = arith.addf %197, %25 : vector<16x32xf32>
    %199 = tpu.concatenate %198, %32, %28 in 0 : vector<16x32xf32>, vector<32x32xf32>, vector<32x32xf32> -> vector<80x32xf32>
    %200 = vector.extract_strided_slice %1 {offsets = [0, 0], sizes = [32, 96], strides = [1, 1]} : vector<32x128xf32> to vector<32x96xf32>
    %cst_55 = arith.constant dense<0.000000e+00> : vector<80x96xf32>
    %201 = tpu.matmul %199, %200, %cst_55 {dimension_numbers = #tpu.dot_dimension_numbers<[1], [0], [0], [1], [0, 0, 1, 1], [], []>} : vector<80x32xf32>, vector<32x96xf32>, vector<80x96xf32> -> vector<80x96xf32>
    %202 = vector.extract_strided_slice %201 {offsets = [0, 0], sizes = [16, 32], strides = [1, 1]} : vector<80x96xf32> to vector<16x32xf32>
    %203 = vector.extract_strided_slice %5 {offsets = [0, 0], sizes = [1, 32], strides = [1, 1]} : vector<1x128xf32> to vector<1x32xf32>
    %204 = vector.broadcast %203 : vector<1x32xf32> to vector<16x32xf32>
    %205 = arith.addf %202, %204 : vector<16x32xf32>
    %206 = vector.extract_strided_slice %201 {offsets = [16, 32], sizes = [32, 32], strides = [1, 1]} : vector<80x96xf32> to vector<32x32xf32>
    %207 = vector.extract_strided_slice %5 {offsets = [0, 32], sizes = [1, 32], strides = [1, 1]} : vector<1x128xf32> to vector<1x32xf32>
    %208 = vector.broadcast %207 : vector<1x32xf32> to vector<32x32xf32>
    %209 = arith.addf %206, %208 : vector<32x32xf32>
    %210 = vector.extract_strided_slice %201 {offsets = [48, 64], sizes = [32, 32], strides = [1, 1]} : vector<80x96xf32> to vector<32x32xf32>
    %211 = vector.extract_strided_slice %5 {offsets = [0, 64], sizes = [1, 32], strides = [1, 1]} : vector<1x128xf32> to vector<1x32xf32>
    %212 = vector.broadcast %211 : vector<1x32xf32> to vector<32x32xf32>
    %213 = arith.addf %210, %212 : vector<32x32xf32>
    %214 = vector.extract_strided_slice %205 {offsets = [0, 0], sizes = [8, 32], strides = [1, 1]} : vector<16x32xf32> to vector<8x32xf32>
    %215 = vector.extract_strided_slice %209 {offsets = [0, 0], sizes = [16, 32], strides = [1, 1]} : vector<32x32xf32> to vector<16x32xf32>
    %216 = vector.extract_strided_slice %213 {offsets = [0, 0], sizes = [16, 32], strides = [1, 1]} : vector<32x32xf32> to vector<16x32xf32>
    %217 = vector.extract_strided_slice %214 {offsets = [0, 0], sizes = [8, 8], strides = [1, 1]} : vector<8x32xf32> to vector<8x8xf32>
    %218 = vector.extract_strided_slice %215 {offsets = [0, 0], sizes = [16, 8], strides = [1, 1]} : vector<16x32xf32> to vector<16x8xf32>
    %cst_56 = arith.constant dense<0.000000e+00> : vector<8x16xf32>
    %219 = tpu.matmul %217, %218, %cst_56 {dimension_numbers = #tpu.dot_dimension_numbers<[1], [1], [0], [0], [0, 0, 1, 0], [], []>} : vector<8x8xf32>, vector<16x8xf32>, vector<8x16xf32> -> vector<8x16xf32>
    %cst_57 = arith.constant dense<0xFF800000> : vector<8xf32>
    %220 = vector.multi_reduction <maximumf>, %219, %cst_57 [1] : vector<8x16xf32> to vector<8xf32>
    %221 = vector.shape_cast %220 : vector<8xf32> to vector<8x1xf32>
    %222 = vector.broadcast %221 : vector<8x1xf32> to vector<8x16xf32>
    %223 = arith.subf %219, %222 : vector<8x16xf32>
    %224 = math.exp %223 : vector<8x16xf32>
    %cst_58 = arith.constant dense<0.000000e+00> : vector<8xf32>
    %225 = vector.multi_reduction <add>, %224, %cst_58 [1] : vector<8x16xf32> to vector<8xf32>
    %226 = vector.shape_cast %225 : vector<8xf32> to vector<8x1xf32>
    %227 = vector.broadcast %226 : vector<8x1xf32> to vector<8x16xf32>
    %228 = arith.divf %224, %227 : vector<8x16xf32>
    %229 = vector.extract_strided_slice %216 {offsets = [0, 0], sizes = [16, 8], strides = [1, 1]} : vector<16x32xf32> to vector<16x8xf32>
    %cst_59 = arith.constant dense<0.000000e+00> : vector<8x8xf32>
    %230 = tpu.matmul %228, %229, %cst_59 {dimension_numbers = #tpu.dot_dimension_numbers<[1], [0], [0], [1], [0, 0, 1, 1], [], []>} : vector<8x16xf32>, vector<16x8xf32>, vector<8x8xf32> -> vector<8x8xf32>
    %231 = vector.extract_strided_slice %214 {offsets = [0, 8], sizes = [8, 8], strides = [1, 1]} : vector<8x32xf32> to vector<8x8xf32>
    %232 = vector.extract_strided_slice %215 {offsets = [0, 8], sizes = [16, 8], strides = [1, 1]} : vector<16x32xf32> to vector<16x8xf32>
    %cst_60 = arith.constant dense<0.000000e+00> : vector<8x16xf32>
    %233 = tpu.matmul %231, %232, %cst_60 {dimension_numbers = #tpu.dot_dimension_numbers<[1], [1], [0], [0], [0, 0, 1, 0], [], []>} : vector<8x8xf32>, vector<16x8xf32>, vector<8x16xf32> -> vector<8x16xf32>
    %cst_61 = arith.constant dense<0xFF800000> : vector<8xf32>
    %234 = vector.multi_reduction <maximumf>, %233, %cst_61 [1] : vector<8x16xf32> to vector<8xf32>
    %235 = vector.shape_cast %234 : vector<8xf32> to vector<8x1xf32>
    %236 = vector.broadcast %235 : vector<8x1xf32> to vector<8x16xf32>
    %237 = arith.subf %233, %236 : vector<8x16xf32>
    %238 = math.exp %237 : vector<8x16xf32>
    %cst_62 = arith.constant dense<0.000000e+00> : vector<8xf32>
    %239 = vector.multi_reduction <add>, %238, %cst_62 [1] : vector<8x16xf32> to vector<8xf32>
    %240 = vector.shape_cast %239 : vector<8xf32> to vector<8x1xf32>
    %241 = vector.broadcast %240 : vector<8x1xf32> to vector<8x16xf32>
    %242 = arith.divf %238, %241 : vector<8x16xf32>
    %243 = vector.extract_strided_slice %216 {offsets = [0, 8], sizes = [16, 8], strides = [1, 1]} : vector<16x32xf32> to vector<16x8xf32>
    %cst_63 = arith.constant dense<0.000000e+00> : vector<8x8xf32>
    %244 = tpu.matmul %242, %243, %cst_63 {dimension_numbers = #tpu.dot_dimension_numbers<[1], [0], [0], [1], [0, 0, 1, 1], [], []>} : vector<8x16xf32>, vector<16x8xf32>, vector<8x8xf32> -> vector<8x8xf32>
    %245 = vector.extract_strided_slice %214 {offsets = [0, 16], sizes = [8, 8], strides = [1, 1]} : vector<8x32xf32> to vector<8x8xf32>
    %246 = vector.extract_strided_slice %215 {offsets = [0, 16], sizes = [16, 8], strides = [1, 1]} : vector<16x32xf32> to vector<16x8xf32>
    %cst_64 = arith.constant dense<0.000000e+00> : vector<8x16xf32>
    %247 = tpu.matmul %245, %246, %cst_64 {dimension_numbers = #tpu.dot_dimension_numbers<[1], [1], [0], [0], [0, 0, 1, 0], [], []>} : vector<8x8xf32>, vector<16x8xf32>, vector<8x16xf32> -> vector<8x16xf32>
    %cst_65 = arith.constant dense<0xFF800000> : vector<8xf32>
    %248 = vector.multi_reduction <maximumf>, %247, %cst_65 [1] : vector<8x16xf32> to vector<8xf32>
    %249 = vector.shape_cast %248 : vector<8xf32> to vector<8x1xf32>
    %250 = vector.broadcast %249 : vector<8x1xf32> to vector<8x16xf32>
    %251 = arith.subf %247, %250 : vector<8x16xf32>
    %252 = math.exp %251 : vector<8x16xf32>
    %cst_66 = arith.constant dense<0.000000e+00> : vector<8xf32>
    %253 = vector.multi_reduction <add>, %252, %cst_66 [1] : vector<8x16xf32> to vector<8xf32>
    %254 = vector.shape_cast %253 : vector<8xf32> to vector<8x1xf32>
    %255 = vector.broadcast %254 : vector<8x1xf32> to vector<8x16xf32>
    %256 = arith.divf %252, %255 : vector<8x16xf32>
    %257 = vector.extract_strided_slice %216 {offsets = [0, 16], sizes = [16, 8], strides = [1, 1]} : vector<16x32xf32> to vector<16x8xf32>
    %cst_67 = arith.constant dense<0.000000e+00> : vector<8x8xf32>
    %258 = tpu.matmul %256, %257, %cst_67 {dimension_numbers = #tpu.dot_dimension_numbers<[1], [0], [0], [1], [0, 0, 1, 1], [], []>} : vector<8x16xf32>, vector<16x8xf32>, vector<8x8xf32> -> vector<8x8xf32>
    %259 = vector.extract_strided_slice %214 {offsets = [0, 24], sizes = [8, 8], strides = [1, 1]} : vector<8x32xf32> to vector<8x8xf32>
    %260 = vector.extract_strided_slice %215 {offsets = [0, 24], sizes = [16, 8], strides = [1, 1]} : vector<16x32xf32> to vector<16x8xf32>
    %cst_68 = arith.constant dense<0.000000e+00> : vector<8x16xf32>
    %261 = tpu.matmul %259, %260, %cst_68 {dimension_numbers = #tpu.dot_dimension_numbers<[1], [1], [0], [0], [0, 0, 1, 0], [], []>} : vector<8x8xf32>, vector<16x8xf32>, vector<8x16xf32> -> vector<8x16xf32>
    %cst_69 = arith.constant dense<0xFF800000> : vector<8xf32>
    %262 = vector.multi_reduction <maximumf>, %261, %cst_69 [1] : vector<8x16xf32> to vector<8xf32>
    %263 = vector.shape_cast %262 : vector<8xf32> to vector<8x1xf32>
    %264 = vector.broadcast %263 : vector<8x1xf32> to vector<8x16xf32>
    %265 = arith.subf %261, %264 : vector<8x16xf32>
    %266 = math.exp %265 : vector<8x16xf32>
    %cst_70 = arith.constant dense<0.000000e+00> : vector<8xf32>
    %267 = vector.multi_reduction <add>, %266, %cst_70 [1] : vector<8x16xf32> to vector<8xf32>
    %268 = vector.shape_cast %267 : vector<8xf32> to vector<8x1xf32>
    %269 = vector.broadcast %268 : vector<8x1xf32> to vector<8x16xf32>
    %270 = arith.divf %266, %269 : vector<8x16xf32>
    %271 = vector.extract_strided_slice %216 {offsets = [0, 24], sizes = [16, 8], strides = [1, 1]} : vector<16x32xf32> to vector<16x8xf32>
    %cst_71 = arith.constant dense<0.000000e+00> : vector<8x8xf32>
    %272 = tpu.matmul %270, %271, %cst_71 {dimension_numbers = #tpu.dot_dimension_numbers<[1], [0], [0], [1], [0, 0, 1, 1], [], []>} : vector<8x16xf32>, vector<16x8xf32>, vector<8x8xf32> -> vector<8x8xf32>
    %273 = tpu.concatenate %230, %244, %258, %272 in 1 : vector<8x8xf32>, vector<8x8xf32>, vector<8x8xf32>, vector<8x8xf32> -> vector<8x32xf32>
    %274 = vector.extract_strided_slice %205 {offsets = [8, 0], sizes = [8, 32], strides = [1, 1]} : vector<16x32xf32> to vector<8x32xf32>
    %275 = vector.extract_strided_slice %209 {offsets = [16, 0], sizes = [16, 32], strides = [1, 1]} : vector<32x32xf32> to vector<16x32xf32>
    %276 = vector.extract_strided_slice %213 {offsets = [16, 0], sizes = [16, 32], strides = [1, 1]} : vector<32x32xf32> to vector<16x32xf32>
    %277 = vector.extract_strided_slice %274 {offsets = [0, 0], sizes = [8, 8], strides = [1, 1]} : vector<8x32xf32> to vector<8x8xf32>
    %278 = vector.extract_strided_slice %275 {offsets = [0, 0], sizes = [16, 8], strides = [1, 1]} : vector<16x32xf32> to vector<16x8xf32>
    %cst_72 = arith.constant dense<0.000000e+00> : vector<8x16xf32>
    %279 = tpu.matmul %277, %278, %cst_72 {dimension_numbers = #tpu.dot_dimension_numbers<[1], [1], [0], [0], [0, 0, 1, 0], [], []>} : vector<8x8xf32>, vector<16x8xf32>, vector<8x16xf32> -> vector<8x16xf32>
    %cst_73 = arith.constant dense<0xFF800000> : vector<8xf32>
    %280 = vector.multi_reduction <maximumf>, %279, %cst_73 [1] : vector<8x16xf32> to vector<8xf32>
    %281 = vector.shape_cast %280 : vector<8xf32> to vector<8x1xf32>
    %282 = vector.broadcast %281 : vector<8x1xf32> to vector<8x16xf32>
    %283 = arith.subf %279, %282 : vector<8x16xf32>
    %284 = math.exp %283 : vector<8x16xf32>
    %cst_74 = arith.constant dense<0.000000e+00> : vector<8xf32>
    %285 = vector.multi_reduction <add>, %284, %cst_74 [1] : vector<8x16xf32> to vector<8xf32>
    %286 = vector.shape_cast %285 : vector<8xf32> to vector<8x1xf32>
    %287 = vector.broadcast %286 : vector<8x1xf32> to vector<8x16xf32>
    %288 = arith.divf %284, %287 : vector<8x16xf32>
    %289 = vector.extract_strided_slice %276 {offsets = [0, 0], sizes = [16, 8], strides = [1, 1]} : vector<16x32xf32> to vector<16x8xf32>
    %cst_75 = arith.constant dense<0.000000e+00> : vector<8x8xf32>
    %290 = tpu.matmul %288, %289, %cst_75 {dimension_numbers = #tpu.dot_dimension_numbers<[1], [0], [0], [1], [0, 0, 1, 1], [], []>} : vector<8x16xf32>, vector<16x8xf32>, vector<8x8xf32> -> vector<8x8xf32>
    %291 = vector.extract_strided_slice %274 {offsets = [0, 8], sizes = [8, 8], strides = [1, 1]} : vector<8x32xf32> to vector<8x8xf32>
    %292 = vector.extract_strided_slice %275 {offsets = [0, 8], sizes = [16, 8], strides = [1, 1]} : vector<16x32xf32> to vector<16x8xf32>
    %cst_76 = arith.constant dense<0.000000e+00> : vector<8x16xf32>
    %293 = tpu.matmul %291, %292, %cst_76 {dimension_numbers = #tpu.dot_dimension_numbers<[1], [1], [0], [0], [0, 0, 1, 0], [], []>} : vector<8x8xf32>, vector<16x8xf32>, vector<8x16xf32> -> vector<8x16xf32>
    %cst_77 = arith.constant dense<0xFF800000> : vector<8xf32>
    %294 = vector.multi_reduction <maximumf>, %293, %cst_77 [1] : vector<8x16xf32> to vector<8xf32>
    %295 = vector.shape_cast %294 : vector<8xf32> to vector<8x1xf32>
    %296 = vector.broadcast %295 : vector<8x1xf32> to vector<8x16xf32>
    %297 = arith.subf %293, %296 : vector<8x16xf32>
    %298 = math.exp %297 : vector<8x16xf32>
    %cst_78 = arith.constant dense<0.000000e+00> : vector<8xf32>
    %299 = vector.multi_reduction <add>, %298, %cst_78 [1] : vector<8x16xf32> to vector<8xf32>
    %300 = vector.shape_cast %299 : vector<8xf32> to vector<8x1xf32>
    %301 = vector.broadcast %300 : vector<8x1xf32> to vector<8x16xf32>
    %302 = arith.divf %298, %301 : vector<8x16xf32>
    %303 = vector.extract_strided_slice %276 {offsets = [0, 8], sizes = [16, 8], strides = [1, 1]} : vector<16x32xf32> to vector<16x8xf32>
    %cst_79 = arith.constant dense<0.000000e+00> : vector<8x8xf32>
    %304 = tpu.matmul %302, %303, %cst_79 {dimension_numbers = #tpu.dot_dimension_numbers<[1], [0], [0], [1], [0, 0, 1, 1], [], []>} : vector<8x16xf32>, vector<16x8xf32>, vector<8x8xf32> -> vector<8x8xf32>
    %305 = vector.extract_strided_slice %274 {offsets = [0, 16], sizes = [8, 8], strides = [1, 1]} : vector<8x32xf32> to vector<8x8xf32>
    %306 = vector.extract_strided_slice %275 {offsets = [0, 16], sizes = [16, 8], strides = [1, 1]} : vector<16x32xf32> to vector<16x8xf32>
    %cst_80 = arith.constant dense<0.000000e+00> : vector<8x16xf32>
    %307 = tpu.matmul %305, %306, %cst_80 {dimension_numbers = #tpu.dot_dimension_numbers<[1], [1], [0], [0], [0, 0, 1, 0], [], []>} : vector<8x8xf32>, vector<16x8xf32>, vector<8x16xf32> -> vector<8x16xf32>
    %cst_81 = arith.constant dense<0xFF800000> : vector<8xf32>
    %308 = vector.multi_reduction <maximumf>, %307, %cst_81 [1] : vector<8x16xf32> to vector<8xf32>
    %309 = vector.shape_cast %308 : vector<8xf32> to vector<8x1xf32>
    %310 = vector.broadcast %309 : vector<8x1xf32> to vector<8x16xf32>
    %311 = arith.subf %307, %310 : vector<8x16xf32>
    %312 = math.exp %311 : vector<8x16xf32>
    %cst_82 = arith.constant dense<0.000000e+00> : vector<8xf32>
    %313 = vector.multi_reduction <add>, %312, %cst_82 [1] : vector<8x16xf32> to vector<8xf32>
    %314 = vector.shape_cast %313 : vector<8xf32> to vector<8x1xf32>
    %315 = vector.broadcast %314 : vector<8x1xf32> to vector<8x16xf32>
    %316 = arith.divf %312, %315 : vector<8x16xf32>
    %317 = vector.extract_strided_slice %276 {offsets = [0, 16], sizes = [16, 8], strides = [1, 1]} : vector<16x32xf32> to vector<16x8xf32>
    %cst_83 = arith.constant dense<0.000000e+00> : vector<8x8xf32>
    %318 = tpu.matmul %316, %317, %cst_83 {dimension_numbers = #tpu.dot_dimension_numbers<[1], [0], [0], [1], [0, 0, 1, 1], [], []>} : vector<8x16xf32>, vector<16x8xf32>, vector<8x8xf32> -> vector<8x8xf32>
    %319 = vector.extract_strided_slice %274 {offsets = [0, 24], sizes = [8, 8], strides = [1, 1]} : vector<8x32xf32> to vector<8x8xf32>
    %320 = vector.extract_strided_slice %275 {offsets = [0, 24], sizes = [16, 8], strides = [1, 1]} : vector<16x32xf32> to vector<16x8xf32>
    %cst_84 = arith.constant dense<0.000000e+00> : vector<8x16xf32>
    %321 = tpu.matmul %319, %320, %cst_84 {dimension_numbers = #tpu.dot_dimension_numbers<[1], [1], [0], [0], [0, 0, 1, 0], [], []>} : vector<8x8xf32>, vector<16x8xf32>, vector<8x16xf32> -> vector<8x16xf32>
    %cst_85 = arith.constant dense<0xFF800000> : vector<8xf32>
    %322 = vector.multi_reduction <maximumf>, %321, %cst_85 [1] : vector<8x16xf32> to vector<8xf32>
    %323 = vector.shape_cast %322 : vector<8xf32> to vector<8x1xf32>
    %324 = vector.broadcast %323 : vector<8x1xf32> to vector<8x16xf32>
    %325 = arith.subf %321, %324 : vector<8x16xf32>
    %326 = math.exp %325 : vector<8x16xf32>
    %cst_86 = arith.constant dense<0.000000e+00> : vector<8xf32>
    %327 = vector.multi_reduction <add>, %326, %cst_86 [1] : vector<8x16xf32> to vector<8xf32>
    %328 = vector.shape_cast %327 : vector<8xf32> to vector<8x1xf32>
    %329 = vector.broadcast %328 : vector<8x1xf32> to vector<8x16xf32>
    %330 = arith.divf %326, %329 : vector<8x16xf32>
    %331 = vector.extract_strided_slice %276 {offsets = [0, 24], sizes = [16, 8], strides = [1, 1]} : vector<16x32xf32> to vector<16x8xf32>
    %cst_87 = arith.constant dense<0.000000e+00> : vector<8x8xf32>
    %332 = tpu.matmul %330, %331, %cst_87 {dimension_numbers = #tpu.dot_dimension_numbers<[1], [0], [0], [1], [0, 0, 1, 1], [], []>} : vector<8x16xf32>, vector<16x8xf32>, vector<8x8xf32> -> vector<8x8xf32>
    %333 = tpu.concatenate %290, %304, %318, %332 in 1 : vector<8x8xf32>, vector<8x8xf32>, vector<8x8xf32>, vector<8x8xf32> -> vector<8x32xf32>
    %334 = tpu.concatenate %273, %333 in 0 : vector<8x32xf32>, vector<8x32xf32> -> vector<16x32xf32>
    %335 = vector.extract_strided_slice %1 {offsets = [0, 96], sizes = [32, 32], strides = [1, 1]} : vector<32x128xf32> to vector<32x32xf32>
    %cst_88 = arith.constant dense<0.000000e+00> : vector<16x32xf32>
    %336 = tpu.matmul %334, %335, %cst_88 {dimension_numbers = #tpu.dot_dimension_numbers<[1], [0], [0], [1], [0, 0, 1, 1], [], []>} : vector<16x32xf32>, vector<32x32xf32>, vector<16x32xf32> -> vector<16x32xf32>
    %337 = arith.addf %197, %336 : vector<16x32xf32>
    %338 = vector.extract_strided_slice %5 {offsets = [0, 96], sizes = [1, 32], strides = [1, 1]} : vector<1x128xf32> to vector<1x32xf32>
    %339 = vector.broadcast %338 : vector<1x32xf32> to vector<16x32xf32>
    %340 = arith.addf %337, %339 : vector<16x32xf32>
    %cst_89 = arith.constant dense<0.000000e+00> : vector<16xf32>
    %341 = vector.multi_reduction <add>, %340, %cst_89 [1] : vector<16x32xf32> to vector<16xf32>
    %342 = vector.shape_cast %341 : vector<16xf32> to vector<16x1xf32>
    %cst_90 = arith.constant 3.200000e+01 : f32
    %343 = vector.broadcast %cst_90 : f32 to vector<16x1xf32>
    %344 = arith.divf %342, %343 : vector<16x1xf32>
    %345 = vector.broadcast %344 : vector<16x1xf32> to vector<16x32xf32>
    %346 = arith.subf %340, %345 : vector<16x32xf32>
    %347 = arith.mulf %346, %346 : vector<16x32xf32>
    %cst_91 = arith.constant dense<0.000000e+00> : vector<16xf32>
    %348 = vector.multi_reduction <add>, %347, %cst_91 [1] : vector<16x32xf32> to vector<16xf32>
    %349 = vector.shape_cast %348 : vector<16xf32> to vector<16x1xf32>
    %cst_92 = arith.constant 3.200000e+01 : f32
    %350 = vector.broadcast %cst_92 : f32 to vector<16x1xf32>
    %351 = arith.divf %349, %350 : vector<16x1xf32>
    %352 = vector.broadcast %344 : vector<16x1xf32> to vector<16x32xf32>
    %353 = arith.subf %340, %352 : vector<16x32xf32>
    %cst_93 = arith.constant 9.99999974E-6 : f32
    %354 = vector.broadcast %cst_93 : f32 to vector<16x1xf32>
    %355 = arith.addf %351, %354 : vector<16x1xf32>
    %356 = math.rsqrt %355 : vector<16x1xf32>
    %357 = vector.broadcast %356 : vector<16x1xf32> to vector<16x32xf32>
    %358 = arith.mulf %353, %357 : vector<16x32xf32>
    %359 = vector.broadcast %12 : vector<1x32xf32> to vector<16x32xf32>
    %360 = arith.mulf %358, %359 : vector<16x32xf32>
    %361 = vector.broadcast %13 : vector<1x32xf32> to vector<16x32xf32>
    %362 = arith.addf %360, %361 : vector<16x32xf32>
    %cst_94 = arith.constant dense<0.000000e+00> : vector<16x64xf32>
    %363 = tpu.matmul %362, %2, %cst_94 {dimension_numbers = #tpu.dot_dimension_numbers<[1], [0], [0], [1], [0, 0, 1, 1], [], []>} : vector<16x32xf32>, vector<32x64xf32>, vector<16x64xf32> -> vector<16x64xf32>
    %364 = vector.broadcast %6 : vector<1x64xf32> to vector<16x64xf32>
    %365 = arith.addf %363, %364 : vector<16x64xf32>
    %cst_95 = arith.constant 0.000000e+00 : f32
    %366 = vector.broadcast %cst_95 : f32 to vector<16x64xf32>
    %367 = arith.maximumf %365, %366 : vector<16x64xf32>
    %cst_96 = arith.constant dense<0.000000e+00> : vector<16x32xf32>
    %368 = tpu.matmul %367, %3, %cst_96 {dimension_numbers = #tpu.dot_dimension_numbers<[1], [0], [0], [1], [0, 0, 1, 1], [], []>} : vector<16x64xf32>, vector<64x32xf32>, vector<16x32xf32> -> vector<16x32xf32>
    %369 = arith.addf %362, %368 : vector<16x32xf32>
    %370 = vector.broadcast %7 : vector<1x32xf32> to vector<16x32xf32>
    %371 = arith.addf %369, %370 : vector<16x32xf32>
    %cst_97 = arith.constant dense<0.000000e+00> : vector<16xf32>
    %372 = vector.multi_reduction <add>, %371, %cst_97 [1] : vector<16x32xf32> to vector<16xf32>
    %373 = vector.shape_cast %372 : vector<16xf32> to vector<16x1xf32>
    %cst_98 = arith.constant 3.200000e+01 : f32
    %374 = vector.broadcast %cst_98 : f32 to vector<16x1xf32>
    %375 = arith.divf %373, %374 : vector<16x1xf32>
    %376 = vector.broadcast %375 : vector<16x1xf32> to vector<16x32xf32>
    %377 = arith.subf %371, %376 : vector<16x32xf32>
    %378 = arith.mulf %377, %377 : vector<16x32xf32>
    %cst_99 = arith.constant dense<0.000000e+00> : vector<16xf32>
    %379 = vector.multi_reduction <add>, %378, %cst_99 [1] : vector<16x32xf32> to vector<16xf32>
    %380 = vector.shape_cast %379 : vector<16xf32> to vector<16x1xf32>
    %cst_100 = arith.constant 3.200000e+01 : f32
    %381 = vector.broadcast %cst_100 : f32 to vector<16x1xf32>
    %382 = arith.divf %380, %381 : vector<16x1xf32>
    %383 = vector.broadcast %375 : vector<16x1xf32> to vector<16x32xf32>
    %384 = arith.subf %371, %383 : vector<16x32xf32>
    %cst_101 = arith.constant 9.99999974E-6 : f32
    %385 = vector.broadcast %cst_101 : f32 to vector<16x1xf32>
    %386 = arith.addf %382, %385 : vector<16x1xf32>
    %387 = math.rsqrt %386 : vector<16x1xf32>
    %388 = vector.broadcast %387 : vector<16x1xf32> to vector<16x32xf32>
    %389 = arith.mulf %384, %388 : vector<16x32xf32>
    %390 = vector.broadcast %14 : vector<1x32xf32> to vector<16x32xf32>
    %391 = arith.mulf %389, %390 : vector<16x32xf32>
    %392 = vector.broadcast %15 : vector<1x32xf32> to vector<16x32xf32>
    %393 = arith.addf %391, %392 : vector<16x32xf32>
    %394 = vector.extract_strided_slice %393 {offsets = [0, 0], sizes = [8, 32], strides = [1, 1]} : vector<16x32xf32> to vector<8x32xf32>
    %395 = vector.extract_strided_slice %393 {offsets = [8, 0], sizes = [8, 32], strides = [1, 1]} : vector<16x32xf32> to vector<8x32xf32>
    %396 = tpu.concatenate %394, %395 in 1 : vector<8x32xf32>, vector<8x32xf32> -> vector<8x64xf32>
    %c0_102 = arith.constant 0 : index
    %c0_103 = arith.constant 0 : index
    %397 = vector.load %arg2[%c0_102, %c0_103] : memref<8x64xf32, #tpu.memory_space<vmem>>, vector<8x64xf32>
    tpu.vector_store %arg2[%c0_102, %c0_103], %396 {strides = array<i32>} : memref<8x64xf32, #tpu.memory_space<vmem>>, vector<8x64xf32>,
    return
  }
}

</mosaic_0001>

<bundles_post_ra>
// kernel: tpu_custom_call.1
= control target key start
LH: loop header
LB: loop body
LE: loop exit
PB: predicated region body
PF: predicated region fallthrough
CT: control target
= control target key end

     0   :  { %7 = vsyncpa [#allocation3], 0  ;;  %s5076_s0 = inlined_call_operand.hbm [shape: f32[48,64], index: 0, kind: input, shape index: {}]   ;;  %s5077_s1 = inlined_call_operand.hbm [shape: f32[168,128], index: 1, kind: input, shape index: {}]   ;;  %s5078_s2 = inlined_call_operand.hbm [shape: f32[8,64], index: 2, kind: output, shape index: {}]  }
   0x1   :  { %8 = vsyncpa [#allocation6], 0 }
   0x2   :  { %9 = vsyncpa [#allocation4], 0  ;;  %s4525_s9 = smov [#allocation2]   ;;  %s4453_s13 = scalar_lea.hbm %s5076_s0, 768 }
   0x3   :  { %s15_s10 = sshll.u32 %s4525_s9, 4  ;;  %p4454_p0 = scmp.ne.s32.totalorder %s5076_s0, %s4453_s13  ;;  %s16_s10 = int_to_ptr.vmem [resolvable:$true] %s15_s10 }
   0x4   :  { %p4457_p1 = scmp.lt.u32.totalorder %s4453_s13, %s5076_s0 }
   0x6   :  { %p4459_p2 = pnand %p4457_p1, %p4454_p0 }
   0x8   :  { %4462 = shalt.err (!%p4459_p2)
}
   0x9   :  { %s4463_s18 = scalar_lea.vmem %s16_s10, 768  ;;  %p4468_p4 = scmp.lt.s32.totalorder %s16_s10, %s16_s10 }
   0xa   :  { %p4464_p3 = scmp.ne.s32.totalorder %s16_s10, %s4463_s18  ;;  %p4469_p5 = scmp.lt.s32.totalorder %s4463_s18, %s4463_s18 }
   0xc   :  { %p4470_p6 = por %p4469_p5, %p4468_p4 }
   0xe   :  { %p4471_p7 = pnand %p4470_p6, %p4464_p3 }
  0x10   :  { %4474 = shalt.err (!%p4471_p7)
}
  0x11   :  { %s4526_s19 = smov 128   ;;  %s4527_s20 = smov 8  }
  0x12   :  { %21 = dma.hbm_to_vmem [thread:$0]  %s5076_s0, 768, %s16_s10, [#allocation3], %s4526_s19, %s4526_s19, %s4527_s20  }
  0x13   :  { %s4528_s23 = smov [#allocation5]   ;;  %s4475_s27 = scalar_lea.hbm %s5077_s1, 2688 }
  0x14   :  { %s27_s24 = sshll.u32 %s4528_s23, 4  ;;  %p4476_p8 = scmp.ne.s32.totalorder %s5077_s1, %s4475_s27  ;;  %s28_s24 = int_to_ptr.vmem [resolvable:$true] %s27_s24 }
  0x15   :  { %p4479_p9 = scmp.lt.u32.totalorder %s4475_s27, %s5077_s1 }
  0x17   :  { %p4481_p10 = pnand %p4479_p9, %p4476_p8 }
  0x19   :  { %4484 = shalt.err (!%p4481_p10)
}
  0x1a   :  { %s4485_s4 = scalar_lea.vmem %s28_s24, 2688  ;;  %p4490_p12 = scmp.lt.s32.totalorder %s28_s24, %s28_s24 }
  0x1b   :  { %p4486_p11 = scmp.ne.s32.totalorder %s28_s24, %s4485_s4  ;;  %p4491_p13 = scmp.lt.s32.totalorder %s4485_s4, %s4485_s4 }
  0x1d   :  { %p4492_p0 = por %p4491_p13, %p4490_p12 }
  0x1f   :  { %p4493_p1 = pnand %p4492_p0, %p4486_p11 }
  0x21   :  { %4496 = shalt.err (!%p4493_p1)
}
  0x22   :  { %33 = dma.hbm_to_vmem [thread:$0]  %s5077_s1, 2688, %s28_s24, [#allocation6], %s4526_s19, %s4526_s19, %s4527_s20  }
  0x23   :  { %4519 = dma.done.wait [#allocation3], 768  }
  0x24   :  { %4520 = vsyncadd [#allocation3], 4294966528 }
  0x25   :  { %4521 = dma.done.wait [#allocation6], 2688  }
  0x26   :  { %4522 = vsyncadd [#allocation6], 4294964608  ;;  %v4588_v0 = vld [vmem:[#allocation2] sm:$0xff]  ;;  %v4590_v1 = vld [vmem:[#allocation2 + $0x8] sm:$0xff]  ;;  %vm101_vm0 = vcmask 261120   ;;  %s4529_s6 = smov 96  }
  0x27   :  { %v4592_v2 = vld [vmem:[#allocation5] sm:$0xff]  ;;  %72 = vrot.lane.b32.xlu0 %v4588_v0, %s4529_s6  ;;  %v4596_v3 = vld [vmem:[#allocation5 + $0x8] sm:$0xff]  ;;  %v4598_v4 = vld [vmem:[#allocation5 + $0x10] sm:$0xff]  ;;  %v99_v6 = vadd.f32 %v4590_v1, %v4588_v0  ;;  %v4530_v13 = vmov 0.0   ;;  %vm4531_vm1 = vmmov 0   ;;  %vm208_vm2 = vcmask 64512  }
  0x28   :  { %v4600_v5 = vld [vmem:[#allocation5 + $0x18] sm:$0xff]  ;;  %v4277_v7 = vpack.i.bf16 %v4596_v3, %v4592_v2  ;;  %v4143_v8 = vpack.c.bf16 %v4596_v3, %v4592_v2  ;;  %3876 = vmatprep.subr.mxu1 %v4530_v13  ;;  %3878 = vmatprep.mubr.msk.f32.mxu1 %vm4531_vm1, %v4530_v13  ;;  %v4630_v14 = vld [vmem:[#allocation5 + $0xa0] ss:$0 sm:$0xff]  ;;  %s4532_s1 = smov 88   ;;  %s4533_s7 = smov 120   ;;  %vm879_vm3 = vcmask 130048   ;;  %vm4847_vm5 = vmpackc.low %vm208_vm2, %vm208_vm2 }
  0x29   :  { %v4147_v9 = vpack.c.bf16 %v4600_v5, %v4598_v4  ;;  %3870 = vmatprep.mubr.msk.f32.mxu0 %vm101_vm0, %v99_v6  ;;  %s4534_s8 = smov 112   ;;  %s4535_s9 = smov 104   ;;  %vm881_vm4 = vcmask 195584   ;;  %vm3499_vm6 = vcmask 523264  }
  0x2a   :  { %4144 = vmatprep.subr.bf16.mxu0 %v4143_v8  ;;  %s4536_s10 = smov 80   ;;  %s4537_s11 = smov 72  }
  0x2b   :  { %76 = vrot.lane.b32.xlu0 %v4590_v1, %s4529_s6  ;;  %4146 = vmatpush3.bf16.msra.mxu0 %v4143_v8  ;;  %s4538_s12 = smov 64   ;;  %s4539_s13 = smov 48  }
  0x2c   :  { %4148 = vmatprep.subr.bf16.mxu0 %v4147_v9  ;;  %s4540_s14 = smov 40   ;;  %s4541_s15 = smov 56  }
  0x2d   :  { %s4542_s16 = smov 32   ;;  %s4543_s17 = smov 16  }
  0x2e   :  { %s4544_s18 = smov 24   ;;  %s4546_s19 = smov [#allocation7]  }
  0x2f   :  { %4150 = vmatpush3.bf16.msra.mxu0 %v4147_v9 }
  0x30   :  { %3891 = vmatprep.subr.mxu0 %v4530_v13 }
  0x99   :  { %v4613_v10 = vpop.permute.xlu0 %72 }
  0x9d   :  { %v4615_v11 = vpop.permute.xlu0 %76 }
  0x9e   :  { %v100_v12 = vadd.f32 %v4615_v11, %v4613_v10 }
  0xa0   :  { %3871 = vmatmul.mubr.msk.f32.vlgmr.msra.gmra.mrb[0].mxu0 %vm101_vm0, %v100_v12 }
  0xa1   :  { %3873 = vmatprep.mubr.msk.f32.mxu0 %vm101_vm0, %v4588_v0 }
  0xa4   :  { %3874 = vmatmul.mubr.msk.f32.gmra.mrb[2].mxu0 %vm101_vm0, %v4613_v10 }
  0xa5   :  { %3893 = vmatprep.mubr.msk.f32.mxu0 %vm4531_vm1, %v4530_v13 }
 0x173   :  { %v3872_v15 = vpop.f32.mrb[0].mxu0 }
 0x174   :  { %v178_v16 = vpop.f32.mrb[1].mxu0  ;;  %v202_v24 = vadd.f32 %v3872_v15, %v4630_v14 }
 0x175   :  { %v201_v17 = vadd.f32 %v4630_v14, %v178_v16 }
 0x177   :  { %206 = vrot.lane.b32.xlu1 %v201_v17, %s4529_s6  ;;  %v4634_v18 = vpop.f32.mrb[2].mxu0 }
 0x178   :  { %v188_v19 = vpop.f32.mrb[3].mxu0 }
 0x179   :  { %v4652_v30 = vadd.f32 %v4630_v14, %v188_v19 }
 0x1e9   :  { %v207_v20 = vpop.permute.xlu1 %206 }
 0x1ea   :  { %3877 = vmatpush3.xpose.msk.msra.mxu1 %vm208_vm2, %v207_v20 }
 0x1eb   :  { %3881 = vmatprep.subr.mxu1 %v4530_v13 }
 0x1ed   :  { %3879 = vmatmul.mubr.msk.f32.vlgmr.msra.gmra.mrb[0].mxu1 %vm208_vm2, %v201_v17 }
 0x1ee   :  { %3883 = vmatprep.mubr.msk.f32.mxu1 %vm4531_vm1, %v4530_v13 }
 0x2c0   :  { %v279_v21 = vpop.f32.mrb[0].mxu1 }
 0x2c1   :  { %v3880_v22 = vpop.f32.mrb[1].mxu1  ;;  %v283_v23 = vsel %vm208_vm2, %v279_v21, -inf }
 0x2c2   :  { %284 = vmax.xlane.f32.xlu1 %v283_v23 }
 0x2d3   :  { %373 = vrot.lane.b32.xlu1 %v201_v17, %s4532_s1 }
 0x2d7   :  { %371 = vrot.lane.b32.xlu1 %v201_v17, %s4533_s7 }
 0x2db   :  { %536 = vrot.lane.b32.xlu1 %v201_v17, %s4534_s8 }
 0x2df   :  { %701 = vrot.lane.b32.xlu1 %v201_v17, %s4535_s9 }
 0x2e3   :  { %1050 = vrot.lane.b32.xlu1 %v202_v24, %s4532_s1 }
 0x2e7   :  { %1215 = vrot.lane.b32.xlu1 %v202_v24, %s4536_s10 }
 0x2eb   :  { %1380 = vrot.lane.b32.xlu1 %v202_v24, %s4537_s11 }
 0x34f   :  { %v285_v25 = vpop.xlane.xlu1 %284 }
 0x350   :  { %v286_v26 = vsub.f32 %v279_v21, %v285_v25 }
 0x352   :  { %v287_v27 = vmul.f32 1.442695, %v286_v26 }
 0x353   :  { %v374_v32 = vpop.permute.xlu1 %373 }
 0x354   :  { %4377 = vpow2.f32 %v287_v27 }
 0x357   :  { %v372_v34 = vpop.permute.xlu1 %371 }
 0x35b   :  { %v537_v38 = vpop.permute.xlu1 %536 }
 0x35e   :  { %v4378_v28 = vpop.eup %4377 }
 0x35f   :  { %v289_v29 = vsel %vm208_vm2, %v4378_v28, 0.0  ;;  %v702_v40 = vpop.permute.xlu1 %701 }
 0x360   :  { %290 = vadd.xlane.f32.xlu0 %v289_v29 }
 0x363   :  { %v1051_v42 = vpop.permute.xlu1 %1050 }
 0x367   :  { %v1216_v44 = vpop.permute.xlu1 %1215 }
 0x36b   :  { %v1381_v46 = vpop.permute.xlu1 %1380 }
 0x376   :  { %295 = vrot.lane.b32.xlu0 %v4652_v30, %s4538_s12 }
 0x37a   :  { %538 = vrot.lane.b32.xlu0 %v201_v17, %s4536_s10 }
 0x37e   :  { %703 = vrot.lane.b32.xlu0 %v201_v17, %s4537_s11 }
 0x382   :  { %884 = vrot.lane.b32.xlu0 %v202_v24, %s4529_s6 }
 0x386   :  { %1048 = vrot.lane.b32.xlu0 %v202_v24, %s4533_s7 }
 0x38a   :  { %1213 = vrot.lane.b32.xlu0 %v202_v24, %s4534_s8 }
 0x38e   :  { %1378 = vrot.lane.b32.xlu0 %v202_v24, %s4535_s9 }
 0x3ed   :  { %v291_v31 = vpop.xlane.xlu0 %290 }
 0x3ee   :  { %4379 = vrcp.f32 %v291_v31 }
 0x3f1   :  { %v296_v33 = vpop.permute.xlu0 %295 }
 0x3f2   :  { %3882 = vmatpush3.msra.mxu1 %v296_v33  ;;  %v204_v33 = vadd.f32 %v4634_v18, %v4630_v14 }
 0x3f3   :  { %3886 = vmatprep.subr.mxu1 %v4530_v13 }
 0x3f5   :  { %v539_v36 = vpop.permute.xlu0 %538 }
 0x3f8   :  { %v4380_v35 = vpop.eup %4379 }
 0x3f9   :  { %v293_v37 = vmul.f32 %v4380_v35, %v4378_v28  ;;  %v704_v39 = vpop.permute.xlu0 %703 }
 0x3fb   :  { %3884 = vmatmul.mubr.msk.f32.vlgmr.msra.gmra.mrb[2].mxu1 %vm208_vm2, %v293_v37 }
 0x3fc   :  { %3887 = vmatpush3.xpose.msk.msra.mxu1 %vm208_vm2, %v374_v32  ;;  %3888 = vmatprep.mubr.msk.f32.mxu1 %vm4531_vm1, %v4530_v13 }
 0x3fd   :  { %3896 = vmatprep.subr.mxu1 %v4530_v13  ;;  %v885_v41 = vpop.permute.xlu0 %884 }
 0x3ff   :  { %3889 = vmatmul.mubr.msk.f32.vlgmr.msra.gmra.mrb[4].mxu1 %vm208_vm2, %v372_v34 }
 0x400   :  { %3897 = vmatpush3.xpose.msk.msra.mxu1 %vm208_vm2, %v539_v36  ;;  %3898 = vmatprep.mubr.msk.f32.mxu1 %vm4531_vm1, %v4530_v13 }
 0x401   :  { %3906 = vmatprep.subr.mxu1 %v4530_v13  ;;  %v1049_v43 = vpop.permute.xlu0 %1048 }
 0x403   :  { %3899 = vmatmul.mubr.msk.f32.vlgmr.msra.gmra.mrb[6].mxu1 %vm208_vm2, %v537_v38 }
 0x404   :  { %3907 = vmatpush3.xpose.msk.msra.mxu1 %vm208_vm2, %v704_v39  ;;  %3908 = vmatprep.mubr.msk.f32.mxu1 %vm4531_vm1, %v4530_v13 }
 0x405   :  { %3916 = vmatprep.subr.mxu1 %v4530_v13  ;;  %v1214_v45 = vpop.permute.xlu0 %1213 }
 0x407   :  { %3909 = vmatmul.mubr.msk.f32.vlgmr.msra.gmra.mrb[8].mxu1 %vm208_vm2, %v702_v40 }
 0x408   :  { %3917 = vmatpush3.xpose.msk.msra.mxu1 %vm208_vm2, %v885_v41  ;;  %3918 = vmatprep.mubr.msk.f32.mxu1 %vm4531_vm1, %v4530_v13 }
 0x409   :  { %3926 = vmatprep.subr.mxu1 %v4530_v13  ;;  %v1379_v47 = vpop.permute.xlu0 %1378 }
 0x40b   :  { %3919 = vmatmul.mubr.msk.f32.vlgmr.msra.gmra.mrb[10].mxu1 %vm208_vm2, %v202_v24 }
 0x40c   :  { %3927 = vmatpush3.xpose.msk.msra.mxu1 %vm208_vm2, %v1051_v42  ;;  %3928 = vmatprep.mubr.msk.f32.mxu1 %vm4531_vm1, %v4530_v13 }
 0x40d   :  { %3936 = vmatprep.subr.mxu1 %v4530_v13 }
 0x40f   :  { %3929 = vmatmul.mubr.msk.f32.vlgmr.msra.gmra.mrb[12].mxu1 %vm208_vm2, %v1049_v43 }
 0x410   :  { %3937 = vmatpush3.xpose.msk.msra.mxu1 %vm208_vm2, %v1216_v44  ;;  %3938 = vmatprep.mubr.msk.f32.mxu1 %vm4531_vm1, %v4530_v13 }
 0x411   :  { %3946 = vmatprep.subr.mxu1 %v4530_v13 }
 0x413   :  { %3939 = vmatmul.mubr.msk.f32.vlgmr.msra.gmra.mrb[14].mxu1 %vm208_vm2, %v1214_v45 }
 0x414   :  { %3947 = vmatpush3.xpose.msk.msra.mxu1 %vm208_vm2, %v1381_v46  ;;  %3948 = vmatprep.mubr.msk.f32.mxu1 %vm4531_vm1, %v4530_v13 }
 0x417   :  { %3949 = vmatmul.mubr.msk.f32.vlgmr.msra.gmra.mrb[16].mxu1 %vm208_vm2, %v1379_v47 }
 0x4ce   :  { %v4698_v48 = vpop.f32.mrb[2].mxu1 }
 0x4cf   :  { %v3885_v49 = vpop.f32.mrb[3].mxu1 }
 0x4d2   :  { %v445_v50 = vpop.f32.mrb[4].mxu1 }
 0x4d3   :  { %v3890_v51 = vpop.f32.mrb[5].mxu1  ;;  %v449_v52 = vsel %vm208_vm2, %v445_v50, -inf }
 0x4d4   :  { %450 = vmax.xlane.f32.xlu1 %v449_v52 }
 0x4d6   :  { %v610_v53 = vpop.f32.mrb[6].mxu1 }
 0x4d7   :  { %v3900_v54 = vpop.f32.mrb[7].mxu1  ;;  %v614_v55 = vsel %vm208_vm2, %v610_v53, -inf }
 0x4d8   :  { %615 = vmax.xlane.f32.xlu0 %v614_v55 }
 0x4da   :  { %v775_v56 = vpop.f32.mrb[8].mxu1 }
 0x4db   :  { %v3910_v57 = vpop.f32.mrb[9].mxu1  ;;  %v779_v58 = vsel %vm208_vm2, %v775_v56, -inf }
 0x4dc   :  { %780 = vmax.xlane.f32.xlu0 %v779_v58 }
 0x4de   :  { %v956_v59 = vpop.f32.mrb[10].mxu1 }
 0x4df   :  { %v3920_v60 = vpop.f32.mrb[11].mxu1  ;;  %v960_v61 = vsel %vm208_vm2, %v956_v59, -inf }
 0x4e0   :  { %961 = vmax.xlane.f32.xlu1 %v960_v61 }
 0x4e2   :  { %v1122_v62 = vpop.f32.mrb[12].mxu1 }
 0x4e3   :  { %v3930_v63 = vpop.f32.mrb[13].mxu1  ;;  %v1126_v6 = vsel %vm208_vm2, %v1122_v62, -inf }
 0x4e4   :  { %1127 = vmax.xlane.f32.xlu0 %v1126_v6 }
 0x4e6   :  { %v1287_v8 = vpop.f32.mrb[14].mxu1 }
 0x4e7   :  { %v3940_v9 = vpop.f32.mrb[15].mxu1  ;;  %v1291_v12 = vsel %vm208_vm2, %v1287_v8, -inf }
 0x4e8   :  { %1292 = vmax.xlane.f32.xlu1 %v1291_v12 }
 0x4ea   :  { %v1452_v15 = vpop.f32.mrb[16].mxu1 }
 0x4eb   :  { %v3950_v16 = vpop.f32.mrb[17].mxu1  ;;  %v1456_v17 = vsel %vm208_vm2, %v1452_v15, -inf }
 0x4ec   :  { %1457 = vmax.xlane.f32.xlu0 %v1456_v17 }
 0x4f9   :  { %625 = vrot.lane.b32.xlu1 %v4652_v30, %s4539_s13 }
 0x4fd   :  { %790 = vrot.lane.b32.xlu1 %v4652_v30, %s4540_s14 }
 0x502   :  { %460 = vrot.lane.b32.xlu0 %v4652_v30, %s4541_s15 }
 0x561   :  { %v451_v19 = vpop.xlane.xlu1 %450 }
 0x562   :  { %v452_v20 = vsub.f32 %v445_v50, %v451_v19 }
 0x564   :  { %v453_v21 = vmul.f32 1.442695, %v452_v20 }
 0x565   :  { %v616_v22 = vpop.xlane.xlu0 %615 }
 0x566   :  { %4381 = vpow2.f32 %v453_v21  ;;  %v617_v23 = vsub.f32 %v610_v53, %v616_v22 }
 0x568   :  { %v618_v24 = vmul.f32 1.442695, %v617_v23 }
 0x569   :  { %v781_v26 = vpop.xlane.xlu0 %780 }
 0x56a   :  { %4383 = vpow2.f32 %v618_v24  ;;  %v782_v34 = vsub.f32 %v775_v56, %v781_v26 }
 0x56c   :  { %v783_v37 = vmul.f32 1.442695, %v782_v34 }
 0x56d   :  { %v962_v35 = vpop.xlane.xlu1 %961 }
 0x56e   :  { %v963_v36 = vsub.f32 %v956_v59, %v962_v35  ;;  %4385 = vpow2.f32 %v783_v37 }
 0x570   :  { %v4382_v25 = vpop.eup %4381  ;;  %v964_v40 = vmul.f32 1.442695, %v963_v36 }
 0x571   :  { %v455_v27 = vsel %vm208_vm2, %v4382_v25, 0.0  ;;  %v1128_v29 = vpop.xlane.xlu0 %1127 }
 0x572   :  { %456 = vadd.xlane.f32.xlu1 %v455_v27  ;;  %v1129_v38 = vsub.f32 %v1122_v62, %v1128_v29  ;;  %4387 = vpow2.f32 %v964_v40 }
 0x574   :  { %v4384_v28 = vpop.eup %4383  ;;  %v1130_v42 = vmul.f32 1.442695, %v1129_v38 }
 0x575   :  { %v620_v31 = vsel %vm208_vm2, %v4384_v28, 0.0  ;;  %v1293_v39 = vpop.xlane.xlu1 %1292 }
 0x576   :  { %621 = vadd.xlane.f32.xlu0 %v620_v31  ;;  %v1294_v41 = vsub.f32 %v1287_v8, %v1293_v39  ;;  %4389 = vpow2.f32 %v1130_v42 }
 0x578   :  { %v1295_v44 = vmul.f32 1.442695, %v1294_v41  ;;  %v4386_v18 = vpop.eup %4385 }
 0x579   :  { %v1458_v32 = vpop.xlane.xlu0 %1457  ;;  %v785_v47 = vsel %vm208_vm2, %v4386_v18, 0.0  ;;  %v626_v56 = vpop.permute.xlu1 %625 }
 0x57a   :  { %v1459_v43 = vsub.f32 %v1452_v15, %v1458_v32  ;;  %4391 = vpow2.f32 %v1295_v44 }
 0x57c   :  { %v1460_v45 = vmul.f32 1.442695, %v1459_v43  ;;  %v4388_v46 = vpop.eup %4387 }
 0x57d   :  { %v461_v30 = vpop.permute.xlu0 %460  ;;  %v966_v51 = vsel %vm208_vm2, %v4388_v46, 0.0  ;;  %v791_v57 = vpop.permute.xlu1 %790 }
 0x57e   :  { %3892 = vmatpush3.msra.mxu0 %v461_v30  ;;  %4393 = vpow2.f32 %v1460_v45 }
 0x57f   :  { %3901 = vmatprep.subr.mxu0 %v4530_v13 }
 0x580   :  { %v4390_v49 = vpop.eup %4389 }
 0x581   :  { %v1132_v52 = vsel %vm208_vm2, %v4390_v49, 0.0 }
 0x583   :  { %1137 = vrot.lane.b32.xlu1 %v204_v33, %s4541_s15 }
 0x584   :  { %v4721_v50 = vpop.eup %4391 }
 0x585   :  { %v1297_v54 = vsel %vm208_vm2, %v4721_v50, 0.0 }
 0x588   :  { %v4725_v53 = vpop.eup %4393 }
 0x589   :  { %v1462_v55 = vsel %vm208_vm2, %v4725_v53, 0.0 }
 0x58c   :  { %972 = vrot.lane.b32.xlu0 %v204_v33, %s4538_s12 }
 0x5a7   :  { %786 = vadd.xlane.f32.xlu1 %v785_v47 }
 0x5ab   :  { %967 = vadd.xlane.f32.xlu0 %v966_v51  ;;  %1133 = vadd.xlane.f32.xlu1 %v1132_v52 }
 0x5af   :  { %1298 = vadd.xlane.f32.xlu0 %v1297_v54  ;;  %1463 = vadd.xlane.f32.xlu1 %v1462_v55 }
 0x5c0   :  { %1467 = vrot.lane.b32.xlu1 %v204_v33, %s4540_s14 }
 0x5c5   :  { %1302 = vrot.lane.b32.xlu0 %v204_v33, %s4539_s13 }
 0x5c9   :  { %4278 = vrot.lane.b32.xlu0 %v4277_v7, %s4542_s16 }
 0x5ff   :  { %v457_v58 = vpop.xlane.xlu1 %456 }
 0x600   :  { %4395 = vrcp.f32 %v457_v58 }
 0x603   :  { %v622_v59 = vpop.xlane.xlu0 %621  ;;  %v1138_v2 = vpop.permute.xlu1 %1137 }
 0x604   :  { %4397 = vrcp.f32 %v622_v59 }
 0x607   :  { %v973_v3 = vpop.permute.xlu0 %972 }
 0x60a   :  { %v4396_v60 = vpop.eup %4395 }
 0x60b   :  { %v459_v61 = vmul.f32 %v4396_v60, %v4382_v25 }
 0x60d   :  { %3894 = vmatmul.mubr.msk.f32.vlgmr.msra.gmra.mrb[4].mxu0 %vm208_vm2, %v459_v61 }
 0x60e   :  { %v4398_v62 = vpop.eup %4397  ;;  %3902 = vmatpush3.msra.mxu0 %v626_v56  ;;  %3903 = vmatprep.mubr.msk.f32.mxu0 %vm4531_vm1, %v4530_v13 }
 0x60f   :  { %v624_v63 = vmul.f32 %v4398_v62, %v4384_v28  ;;  %3911 = vmatprep.subr.mxu0 %v4530_v13  ;;  %v4282_v28 = vpack.i.bf16 %v4600_v5, %v4598_v4 }
 0x611   :  { %3904 = vmatmul.mubr.msk.f32.vlgmr.msra.gmra.mrb[6].mxu0 %vm208_vm2, %v624_v63  ;;  %4283 = vrot.lane.b32.xlu1 %v4282_v28, %s4542_s16  ;;  %v67_v28 = vld [vmem:[#allocation2 + $0x10] sm:$0xff] }
 0x612   :  { %3912 = vmatpush3.msra.mxu0 %v791_v57  ;;  %3913 = vmatprep.mubr.msk.f32.mxu0 %vm4531_vm1, %v4530_v13 }
 0x613   :  { %3921 = vmatprep.subr.mxu0 %v4530_v13 }
 0x634   :  { %v787_v7 = vpop.xlane.xlu1 %786 }
 0x635   :  { %4399 = vrcp.f32 %v787_v7 }
 0x638   :  { %v968_v6 = vpop.xlane.xlu0 %967  ;;  %v1134_v8 = vpop.xlane.xlu1 %1133 }
 0x639   :  { %4401 = vrcp.f32 %v968_v6 }
 0x63a   :  { %4403 = vrcp.f32 %v1134_v8 }
 0x63c   :  { %v1299_v9 = vpop.xlane.xlu0 %1298  ;;  %v1464_v16 = vpop.xlane.xlu1 %1463 }
 0x63d   :  { %4405 = vrcp.f32 %v1299_v9 }
 0x63e   :  { %4407 = vrcp.f32 %v1464_v16 }
 0x63f   :  { %v4400_v12 = vpop.eup %4399 }
 0x640   :  { %v789_v15 = vmul.f32 %v4400_v12, %v4386_v18  ;;  %v1303_v23 = vpop.permute.xlu0 %1302  ;;  %v1468_v26 = vpop.permute.xlu1 %1467 }
 0x642   :  { %3914 = vmatmul.mubr.msk.f32.vlgmr.msra.gmra.mrb[8].mxu0 %vm208_vm2, %v789_v15 }
 0x643   :  { %3922 = vmatpush3.msra.mxu0 %v973_v3  ;;  %3923 = vmatprep.mubr.msk.f32.mxu0 %vm4531_vm1, %v4530_v13  ;;  %v4402_v17 = vpop.eup %4401 }
 0x644   :  { %3931 = vmatprep.subr.mxu0 %v4530_v13  ;;  %v970_v19 = vmul.f32 %v4402_v17, %v4388_v46  ;;  %v4404_v20 = vpop.eup %4403  ;;  %v4279_v29 = vpop.permute.xlu0 %4278 }
 0x645   :  { %v1136_v21 = vmul.f32 %v4404_v20, %v4390_v49  ;;  %v4281_v31 = vunpack.i.h.bf16 %v4279_v29  ;;  %v4280_v32 = vunpack.i.l.bf16 %v4279_v29  ;;  %v68_v29 = vld [vmem:[#allocation2 + $0x18] sm:$0xff] }
 0x646   :  { %3924 = vmatmul.mubr.msk.f32.vlgmr.msra.gmra.mrb[10].mxu0 %vm208_vm2, %v970_v19 }
 0x647   :  { %3932 = vmatpush3.msra.mxu0 %v1138_v2  ;;  %3933 = vmatprep.mubr.msk.f32.mxu0 %vm4531_vm1, %v4530_v13  ;;  %v4406_v22 = vpop.eup %4405  ;;  %v4151_v30 = vpack.c.bf16 %v4281_v31, %v4280_v32  ;;  %v69_v31 = vld [vmem:[#allocation2 + $0x20] sm:$0xff]  ;;  %v70_v32 = vld [vmem:[#allocation2 + $0x28] sm:$0xff] }
 0x648   :  { %3941 = vmatprep.subr.mxu0 %v4530_v13  ;;  %v1301_v24 = vmul.f32 %v4406_v22, %v4721_v50  ;;  %v4408_v25 = vpop.eup %4407  ;;  %v4793_v22 = vld [vmem:[#allocation5 + $0x28] sm:$0xff] }
 0x649   :  { %v1466_v27 = vmul.f32 %v4408_v25, %v4725_v53  ;;  %4152 = vmatprep.subr.bf16.mxu1 %v4151_v30  ;;  %v4801_v25 = vld [vmem:[#allocation5 + $0x30] sm:$0xff] }
 0x64a   :  { %3934 = vmatmul.mubr.msk.f32.vlgmr.msra.gmra.mrb[12].mxu0 %vm208_vm2, %v1136_v21  ;;  %4154 = vmatpush3.bf16.msra.mxu1 %v4151_v30  ;;  %v4791_v21 = vld [vmem:[#allocation5 + $0x20] sm:$0xff] }
 0x64b   :  { %3942 = vmatpush3.msra.mxu0 %v1303_v23  ;;  %3943 = vmatprep.mubr.msk.f32.mxu0 %vm4531_vm1, %v4530_v13  ;;  %v4795_v23 = vld [vmem:[#allocation5 + $0xa3] ss:$0 sm:$0xff] }
 0x64c   :  { %3951 = vmatprep.subr.mxu0 %v4530_v13 }
 0x64e   :  { %3944 = vmatmul.mubr.msk.f32.vlgmr.msra.gmra.mrb[14].mxu0 %vm208_vm2, %v1301_v24  ;;  %v4159_v24 = vpack.c.bf16 %v4793_v22, %v4791_v21 }
 0x64f   :  { %3952 = vmatpush3.msra.mxu0 %v1468_v26  ;;  %3953 = vmatprep.mubr.msk.f32.mxu0 %vm4531_vm1, %v4530_v13  ;;  %v4803_v26 = vld [vmem:[#allocation5 + $0x38] sm:$0xff] }
 0x650   :  { %4160 = vmatprep.subr.bf16.mxu0 %v4159_v24 }
 0x652   :  { %3954 = vmatmul.mubr.msk.f32.vlgmr.msra.gmra.mrb[16].mxu0 %vm208_vm2, %v1466_v27  ;;  %v4163_v27 = vpack.c.bf16 %v4803_v26, %v4801_v25 }
 0x653   :  { %4162 = vmatpush3.bf16.msra.mxu0 %v4159_v24 }
 0x654   :  { %4164 = vmatprep.subr.bf16.mxu0 %v4163_v27 }
 0x657   :  { %4166 = vmatpush3.bf16.msra.mxu0 %v4163_v27 }
 0x683   :  { %v4284_v33 = vpop.permute.xlu1 %4283 }
 0x684   :  { %v4286_v34 = vunpack.i.h.bf16 %v4284_v33  ;;  %v4285_v35 = vunpack.i.l.bf16 %v4284_v33 }
 0x686   :  { %v4155_v36 = vpack.c.bf16 %v4286_v34, %v4285_v35 }
 0x688   :  { %4156 = vmatprep.subr.bf16.mxu1 %v4155_v36 }
 0x689   :  { %4158 = vmatpush3.bf16.msra.mxu1 %v4155_v36 }
 0x6e0   :  { %v532_v37 = vpop.f32.mrb[4].mxu0 }
 0x6e1   :  { %867 = vrot.lane.b32.xlu0 %v532_v37, %s4527_s20  ;;  %v3895_v38 = vpop.f32.mrb[5].mxu0 }
 0x6e4   :  { %v697_v39 = vpop.f32.mrb[6].mxu0 }
 0x6e5   :  { %871 = vrot.lane.b32.xlu1 %v697_v39, %s4543_s17  ;;  %v3905_v4 = vpop.f32.mrb[7].mxu0 }
 0x715   :  { %v862_v5 = vpop.f32.mrb[8].mxu0 }
 0x716   :  { %875 = vrot.lane.b32.xlu1 %v862_v5, %s4544_s18  ;;  %v3915_v40 = vpop.f32.mrb[9].mxu0 }
 0x719   :  { %v1044_v41 = vpop.f32.mrb[10].mxu0 }
 0x71a   :  { %v3925_v42 = vpop.f32.mrb[11].mxu0 }
 0x71d   :  { %v1209_v43 = vpop.f32.mrb[12].mxu0 }
 0x71e   :  { %1544 = vrot.lane.b32.xlu0 %v1209_v43, %s4527_s20  ;;  %v3935_v44 = vpop.f32.mrb[13].mxu0 }
 0x721   :  { %v1374_v45 = vpop.f32.mrb[14].mxu0 }
 0x722   :  { %1548 = vrot.lane.b32.xlu0 %v1374_v45, %s4543_s17  ;;  %v3945_v18 = vpop.f32.mrb[15].mxu0 }
 0x723   :  { %v95_v18 = vadd.f32 %v69_v31, %v67_v28 }
 0x725   :  { %v1539_v46 = vpop.f32.mrb[16].mxu0 }
 0x726   :  { %1552 = vrot.lane.b32.xlu1 %v1539_v46, %s4544_s18  ;;  %v3955_v47 = vpop.f32.mrb[17].mxu0  ;;  %1658 = vrot.lane.b32.xlu0 %v4630_v14, %s4542_s16 }
 0x727   :  { %v96_v47 = vadd.f32 %v70_v32, %v68_v29 }
 0x753   :  { %v868_v49 = vpop.permute.xlu0 %867 }
 0x754   :  { %v878_v51 = vsel %vm208_vm2, %v4698_v48, %v868_v49 }
 0x757   :  { %v872_v50 = vpop.permute.xlu1 %871 }
 0x758   :  { %v880_v52 = vsel %vm879_vm3, %v878_v51, %v872_v50 }
 0x788   :  { %v876_v53 = vpop.permute.xlu1 %875 }
 0x789   :  { %v882_v54 = vsel %vm881_vm4, %v880_v52, %v876_v53 }
 0x78a   :  { %3964 = vmatprep.mubr.msk.f32.mxu1 %vm101_vm0, %v882_v54  ;;  %v4545_v54 = vmov 0.0|0.0  }
 0x78b   :  { %4167 = vmatprep.subr.bf16.mxu0 %v4545_v54  ;;  %4171 = vmatprep.subr.bf16.mxu1 %v4545_v54 }
 0x790   :  { %v1545_v55 = vpop.permute.xlu0 %1544 }
 0x791   :  { %v1555_v57 = vsel %vm208_vm2, %v1044_v41, %v1545_v55 }
 0x794   :  { %v1549_v56 = vpop.permute.xlu0 %1548 }
 0x795   :  { %v1556_v14 = vsel %vm879_vm3, %v1555_v57, %v1549_v56  ;;  %v4837_v56 = vld [vmem:[#allocation5 + $0xa1] ss:$0 sm:$0xff] }
 0x798   :  { %v1553_v58 = vpop.permute.xlu1 %1552  ;;  %v1659_v60 = vpop.permute.xlu0 %1658 }
 0x799   :  { %v1557_v59 = vsel %vm881_vm4, %v1556_v14, %v1553_v58 }
 0x79a   :  { %3965 = vmatmul.mubr.msk.f32.vlgmr.msra.gmra.mrb[18].mxu1 %vm101_vm0, %v1557_v59 }
 0x79b   :  { %4001 = vmatprep.mubr.msk.f32.mxu1 %vm4531_vm1, %v4530_v13 }
 0x86d   :  { %v3966_v48 = vpop.f32.mrb[18].mxu1 }
 0x86e   :  { %v1656_v61 = vadd.f32 %v3966_v48, %v4613_v10  ;;  %v1646_v62 = vpop.f32.mrb[19].mxu1 }
 0x86f   :  { %v1655_v63 = vadd.f32 %v1646_v62, %v4588_v0 }
 0x870   :  { %v1662_v2 = vadd.f32 %v1659_v60, %v1656_v61 }
 0x871   :  { %v1661_v3 = vadd.f32 %v1659_v60, %v1655_v63 }
 0x872   :  { %v1666_v7 = vsel %vm101_vm0, %v1662_v2, 0.0 }
 0x873   :  { %1667 = vadd.xlane.f32.xlu0 %v1666_v7  ;;  %v1663_v6 = vsel %vm101_vm0, %v1661_v3, 0.0 }
 0x874   :  { %1664 = vadd.xlane.f32.xlu1 %v1663_v6 }
 0x900   :  { %v1668_v8 = vpop.xlane.xlu0 %1667 }
 0x901   :  { %v1671_v9 = vmul.f32 0.03125, %v1668_v8  ;;  %v1665_v12 = vpop.xlane.xlu1 %1664 }
 0x902   :  { %v1670_v15 = vmul.f32 0.03125, %v1665_v12 }
 0x903   :  { %v1673_v16 = vsub.f32 %v1662_v2, %v1671_v9  ;;  %v4372_v9 = vpack.i.bf16 %v4803_v26, %v4801_v25 }
 0x904   :  { %v1672_v17 = vsub.f32 %v1661_v3, %v1670_v15 }
 0x905   :  { %v1675_v19 = vmul.f32 %v1673_v16, %v1673_v16 }
 0x906   :  { %v1674_v20 = vmul.f32 %v1672_v17, %v1672_v17 }
 0x907   :  { %v1679_v10 = vsel %vm101_vm0, %v1675_v19, 0.0 }
 0x908   :  { %1680 = vadd.xlane.f32.xlu1 %v1679_v10  ;;  %v1676_v0 = vsel %vm101_vm0, %v1674_v20, 0.0 }
 0x909   :  { %1677 = vadd.xlane.f32.xlu0 %v1676_v0 }
 0x919   :  { %81 = vrot.lane.b32.xlu1 %v67_v28, %s4529_s6 }
 0x91d   :  { %89 = vrot.lane.b32.xlu1 %v69_v31, %s4529_s6 }
 0x91f   :  { %1697 = vrot.lane.b32.xlu0 %v4795_v23, %s4529_s6 }
 0x921   :  { %91 = vrot.lane.b32.xlu1 %v70_v32, %s4529_s6 }
 0x923   :  { %83 = vrot.lane.b32.xlu0 %v68_v29, %s4529_s6 }
 0x995   :  { %v1681_v30 = vpop.xlane.xlu1 %1680 }
 0x996   :  { %v1683_v33 = vmul.f32 0.03125, %v1681_v30  ;;  %v1678_v34 = vpop.xlane.xlu0 %1677 }
 0x997   :  { %v1682_v35 = vmul.f32 0.03125, %v1678_v34 }
 0x998   :  { %v1685_v36 = vadd.f32 1e-05, %v1683_v33 }
 0x999   :  { %v1684_v37 = vadd.f32 1e-05, %v1682_v35  ;;  %v82_v49 = vpop.permute.xlu1 %81 }
 0x99a   :  { %4409 = vrsqrt.f32 %v1685_v36  ;;  %v1698_v40 = vpop.permute.xlu0 %1697 }
 0x99b   :  { %4411 = vrsqrt.f32 %v1684_v37 }
 0x99d   :  { %v90_v50 = vpop.permute.xlu1 %89 }
 0x99e   :  { %v97_v51 = vadd.f32 %v90_v50, %v82_v49  ;;  %v84_v52 = vpop.permute.xlu0 %83 }
 0x9a4   :  { %v4410_v38 = vpop.eup %4409 }
 0x9a5   :  { %v4412_v39 = vpop.eup %4411  ;;  %v1689_v4 = vmul.f32 %v4410_v38, %v1673_v16 }
 0x9a6   :  { %v1688_v5 = vmul.f32 %v4412_v39, %v1672_v17 }
 0x9a7   :  { %v1695_v41 = vmul.f32 %v4795_v23, %v1689_v4 }
 0x9a8   :  { %v1694_v42 = vmul.f32 %v4795_v23, %v1688_v5 }
 0x9a9   :  { %v4813_v43 = vadd.f32 %v1698_v40, %v1695_v41 }
 0x9aa   :  { %v4815_v44 = vadd.f32 %v1698_v40, %v1694_v42 }
 0x9ab   :  { %v1703_v46 = vadd.f32 %v4813_v43, %v4615_v11 }
 0x9ac   :  { %v1702_v45 = vadd.f32 %v4815_v44, %v4590_v1  ;;  %v92_v1 = vpop.permute.xlu1 %91 }
 0x9ad   :  { %v98_v53 = vadd.f32 %v92_v1, %v84_v52 }
 0x9ae   :  { %3975 = vmatprep.mubr.msk.f32.mxu0 %vm101_vm0, %v1702_v45 }
 0x9af   :  { %3976 = vmatmul.mubr.msk.f32.vlgmr.msra.gmra.mrb[18].mxu0 %vm101_vm0, %v1703_v46 }
 0x9b0   :  { %3978 = vmatprep.mubr.msk.f32.mxu0 %vm101_vm0, %v95_v18 }
 0x9b3   :  { %3979 = vmatmul.mubr.msk.f32.gmra.mrb[20].mxu0 %vm101_vm0, %v96_v47 }
 0x9b4   :  { %3981 = vmatprep.mubr.msk.f32.mxu0 %vm101_vm0, %v97_v51 }
 0x9b7   :  { %3982 = vmatmul.mubr.msk.f32.gmra.mrb[22].mxu0 %vm101_vm0, %v98_v53 }
 0x9b8   :  { %3984 = vmatprep.mubr.msk.f32.mxu0 %vm101_vm0, %v67_v28 }
 0x9bb   :  { %3985 = vmatmul.mubr.msk.f32.gmra.mrb[24].mxu0 %vm101_vm0, %v68_v29 }
 0x9bc   :  { %3987 = vmatprep.mubr.msk.f32.mxu0 %vm101_vm0, %v82_v49 }
 0x9bf   :  { %3988 = vmatmul.mubr.msk.f32.gmra.mrb[26].mxu0 %vm101_vm0, %v84_v52 }
 0x9c0   :  { %3994 = vmatprep.mubr.msk.f32.mxu0 %vm4531_vm1, %v4530_v13 }
 0xa82   :  { %v4833_v11 = vpop.f32.mrb[18].mxu0 }
 0xa83   :  { %v1796_v55 = vpop.f32.mrb[19].mxu0 }
 0xa84   :  { %v4855_v15 = vadd.f32 %v4837_v56, %v1796_v55 }
 0xa86   :  { %v3980_v57 = vpop.f32.mrb[20].mxu0 }
 0xa87   :  { %v1852_v14 = vadd.f32 %v3980_v57, %v4837_v56  ;;  %v1806_v58 = vpop.f32.mrb[21].mxu0 }
 0xa88   :  { %v1851_v59 = vadd.f32 %v4837_v56, %v1806_v58 }
 0xa8a   :  { %v4841_v48 = vpack.i.bf16 %v1852_v14, %v1851_v59  ;;  %v3983_v60 = vpop.f32.mrb[22].mxu0 }
 0xa8b   :  { %v1816_v61 = vpop.f32.mrb[23].mxu0  ;;  %v1854_v19 = vadd.f32 %v3983_v60, %v4837_v56 }
 0xa8c   :  { %4288 = vrot.lane.b32.xlu0 %v4841_v48, %s4529_s6  ;;  %v1853_v20 = vadd.f32 %v4837_v56, %v1816_v61 }
 0xa8e   :  { %v3986_v62 = vpop.f32.mrb[24].mxu0  ;;  %v4867_v0 = vpack.i.bf16 %v1854_v19, %v1853_v20 }
 0xa8f   :  { %v1826_v63 = vpop.f32.mrb[25].mxu0  ;;  %v1856_v24 = vadd.f32 %v3986_v62, %v4837_v56 }
 0xa90   :  { %v1855_v27 = vadd.f32 %v4837_v56, %v1826_v63 }
 0xa92   :  { %v3989_v2 = vpop.f32.mrb[26].mxu0  ;;  %v4871_v28 = vpack.i.bf16 %v1856_v24, %v1855_v27 }
 0xa93   :  { %v1836_v3 = vpop.f32.mrb[27].mxu0  ;;  %v1858_v16 = vadd.f32 %v3989_v2, %v4837_v56 }
 0xa94   :  { %v1857_v17 = vadd.f32 %v4837_v56, %v1836_v3 }
 0xa96   :  { %v4865_v10 = vpack.i.bf16 %v1858_v16, %v1857_v17 }
 0xafe   :  { %v4289_v7 = vpop.permute.xlu0 %4288 }
 0xaff   :  { %v4291_v6 = vunpack.i.h.bf16 %v4289_v7  ;;  %v4290_v8 = vunpack.i.l.bf16 %v4289_v7 }
 0xb01   :  { %v4168_v12 = vpack.c.bf16 %v4291_v6, %v4290_v8 }
 0xb03   :  { %4170 = vmatpush3.bf16.xpose.msk.msra.mxu0 %vm4847_vm5, %v4168_v12 }
 0xb04   :  { %4178 = vmatprep.subr.bf16.mxu0 %v4545_v54 }
 0xb0a   :  { %3995 = vmatmul.mubr.msk.f32.vlgmr.msra.gmra.mrb[28].mxu0 %vm208_vm2, %v4855_v15 }
 0xb0b   :  { %4015 = vmatprep.mubr.msk.f32.mxu0 %vm4531_vm1, %v4530_v13 }
 0xbdd   :  { %v1938_v29 = vpop.f32.mrb[28].mxu0 }
 0xbde   :  { %v3996_v31 = vpop.f32.mrb[29].mxu0  ;;  %v1942_v32 = vsel %vm879_vm3, %v1938_v29, -inf }
 0xbdf   :  { %1943 = vmax.xlane.f32.xlu1 %v1942_v32 }
 0xbf0   :  { %4298 = vrot.lane.b32.xlu1 %v4841_v48, %s4532_s1 }
 0xbf4   :  { %2034 = vrot.lane.b32.xlu1 %v4855_v15, %s4533_s7 }
 0xbf8   :  { %2206 = vrot.lane.b32.xlu1 %v4855_v15, %s4534_s8 }
 0xc6c   :  { %v1944_v30 = vpop.xlane.xlu1 %1943 }
 0xc6d   :  { %v1945_v33 = vsub.f32 %v1938_v29, %v1944_v30 }
 0xc6f   :  { %v1946_v34 = vmul.f32 1.442695, %v1945_v33 }
 0xc70   :  { %v4299_v40 = vpop.permute.xlu1 %4298 }
 0xc71   :  { %4413 = vpow2.f32 %v1946_v34  ;;  %v4301_v42 = vunpack.i.h.bf16 %v4299_v40  ;;  %v4300_v45 = vunpack.i.l.bf16 %v4299_v40 }
 0xc73   :  { %v4175_v46 = vpack.c.bf16 %v4301_v42, %v4300_v45 }
 0xc74   :  { %v2035_v51 = vpop.permute.xlu1 %2034 }
 0xc78   :  { %v2207_v1 = vpop.permute.xlu1 %2206 }
 0xc7b   :  { %v4414_v35 = vpop.eup %4413 }
 0xc7c   :  { %v1948_v36 = vsel %vm879_vm3, %v4414_v35, 0.0 }
 0xc7d   :  { %1949 = vadd.xlane.f32.xlu0 %v1948_v36 }
 0xc93   :  { %4293 = vrot.lane.b32.xlu0 %v4871_v28, %s4538_s12 }
 0xc97   :  { %4303 = vrot.lane.b32.xlu0 %v4841_v48, %s4536_s10 }
 0xd0a   :  { %v1950_v37 = vpop.xlane.xlu0 %1949 }
 0xd0b   :  { %4415 = vrcp.f32 %v1950_v37 }
 0xd0e   :  { %v4294_v38 = vpop.permute.xlu0 %4293 }
 0xd0f   :  { %v4296_v39 = vunpack.i.h.bf16 %v4294_v38  ;;  %v4295_v4 = vunpack.i.l.bf16 %v4294_v38 }
 0xd11   :  { %v4172_v5 = vpack.c.bf16 %v4296_v39, %v4295_v4 }
 0xd12   :  { %v4304_v47 = vpop.permute.xlu0 %4303 }
 0xd13   :  { %4173 = vmatpush3.bf16.msra.mxu1 %v4172_v5  ;;  %v4306_v49 = vunpack.i.h.bf16 %v4304_v47  ;;  %v4305_v50 = vunpack.i.l.bf16 %v4304_v47 }
 0xd14   :  { %4174 = vmatprep.subr.bf16.mxu1 %v4545_v54 }
 0xd15   :  { %v4416_v41 = vpop.eup %4415  ;;  %v4182_v52 = vpack.c.bf16 %v4306_v49, %v4305_v50 }
 0xd16   :  { %v1952_v18 = vmul.f32 %v4416_v41, %v4414_v35 }
 0xd18   :  { %4002 = vmatmul.mubr.msk.f32.vlgmr.msra.gmra.mrb[20].mxu1 %vm879_vm3, %v1952_v18 }
 0xd19   :  { %4008 = vmatprep.mubr.msk.f32.mxu1 %vm4531_vm1, %v4530_v13 }
 0xd1c   :  { %4177 = vmatpush3.bf16.xpose.msk.msra.mxu1 %vm4847_vm5, %v4175_v46 }
 0xd1d   :  { %4181 = vmatprep.subr.bf16.mxu1 %v4545_v54 }
 0xd23   :  { %4009 = vmatmul.mubr.msk.f32.vlgmr.msra.gmra.mrb[22].mxu1 %vm208_vm2, %v2035_v51 }
 0xd24   :  { %4184 = vmatpush3.bf16.xpose.msk.msra.mxu1 %vm4847_vm5, %v4182_v52  ;;  %4022 = vmatprep.mubr.msk.f32.mxu1 %vm4531_vm1, %v4530_v13 }
 0xd25   :  { %4192 = vmatprep.subr.bf16.mxu1 %v4545_v54 }
 0xd2b   :  { %4023 = vmatmul.mubr.msk.f32.vlgmr.msra.gmra.mrb[24].mxu1 %vm208_vm2, %v2207_v1 }
 0xd2c   :  { %4043 = vmatprep.mubr.msk.f32.mxu1 %vm4531_vm1, %v4530_v13 }
 0xdeb   :  { %v4901_v53 = vpop.f32.mrb[20].mxu1 }
 0xdec   :  { %v4003_v55 = vpop.f32.mrb[21].mxu1 }
 0xdf6   :  { %v2112_v57 = vpop.f32.mrb[22].mxu1 }
 0xdf7   :  { %v4010_v14 = vpop.f32.mrb[23].mxu1  ;;  %v2116_v58 = vsel %vm879_vm3, %v2112_v57, -inf }
 0xdf8   :  { %2117 = vmax.xlane.f32.xlu0 %v2116_v58 }
 0xdfe   :  { %v2284_v59 = vpop.f32.mrb[24].mxu1 }
 0xdff   :  { %v4024_v60 = vpop.f32.mrb[25].mxu1  ;;  %v2288_v61 = vsel %vm879_vm3, %v2284_v59, -inf }
 0xe00   :  { %2289 = vmax.xlane.f32.xlu1 %v2288_v61 }
 0xe11   :  { %4308 = vrot.lane.b32.xlu1 %v4871_v28, %s4541_s15 }
 0xe15   :  { %4318 = vrot.lane.b32.xlu1 %v4841_v48, %s4537_s11 }
 0xe19   :  { %2378 = vrot.lane.b32.xlu1 %v4855_v15, %s4535_s9 }
 0xe85   :  { %v2118_v62 = vpop.xlane.xlu0 %2117 }
 0xe86   :  { %v2119_v63 = vsub.f32 %v2112_v57, %v2118_v62 }
 0xe88   :  { %v2120_v2 = vmul.f32 1.442695, %v2119_v63 }
 0xe8a   :  { %4417 = vpow2.f32 %v2120_v2 }
 0xe8d   :  { %v2290_v3 = vpop.xlane.xlu1 %2289 }
 0xe8e   :  { %v2291_v7 = vsub.f32 %v2284_v59, %v2290_v3  ;;  %v4948_v3 = vadd.f32 %v4833_v11, %v4837_v56 }
 0xe90   :  { %v2292_v6 = vmul.f32 1.442695, %v2291_v7 }
 0xe91   :  { %v4309_v8 = vpop.permute.xlu1 %4308 }
 0xe92   :  { %4419 = vpow2.f32 %v2292_v6  ;;  %v4311_v12 = vunpack.i.h.bf16 %v4309_v8  ;;  %v4310_v16 = vunpack.i.l.bf16 %v4309_v8 }
 0xe94   :  { %v4418_v17 = vpop.eup %4417  ;;  %v4179_v19 = vpack.c.bf16 %v4311_v12, %v4310_v16 }
 0xe95   :  { %v2122_v20 = vsel %vm879_vm3, %v4418_v17, 0.0  ;;  %v4319_v35 = vpop.permute.xlu1 %4318 }
 0xe96   :  { %2123 = vadd.xlane.f32.xlu0 %v2122_v20  ;;  %4180 = vmatpush3.bf16.msra.mxu0 %v4179_v19  ;;  %v4321_v37 = vunpack.i.h.bf16 %v4319_v35  ;;  %v4320_v38 = vunpack.i.l.bf16 %v4319_v35 }
 0xe97   :  { %4185 = vmatprep.subr.bf16.mxu0 %v4545_v54 }
 0xe98   :  { %v4189_v4 = vpack.c.bf16 %v4321_v37, %v4320_v38 }
 0xe99   :  { %v2379_v5 = vpop.permute.xlu1 %2378 }
 0xe9c   :  { %v4420_v48 = vpop.eup %4419 }
 0xe9d   :  { %v2294_v15 = vsel %vm879_vm3, %v4420_v48, 0.0 }
 0xe9e   :  { %2295 = vadd.xlane.f32.xlu0 %v2294_v15 }
 0xeb4   :  { %4313 = vrot.lane.b32.xlu0 %v4871_v28, %s4539_s13 }
 0xf23   :  { %v2124_v24 = vpop.xlane.xlu0 %2123 }
 0xf24   :  { %4421 = vrcp.f32 %v2124_v24 }
 0xf2b   :  { %v2296_v27 = vpop.xlane.xlu0 %2295 }
 0xf2c   :  { %4423 = vrcp.f32 %v2296_v27 }
 0xf2e   :  { %v4422_v29 = vpop.eup %4421 }
 0xf2f   :  { %v2126_v31 = vmul.f32 %v4422_v29, %v4418_v17  ;;  %v4314_v32 = vpop.permute.xlu0 %4313 }
 0xf30   :  { %v4316_v30 = vunpack.i.h.bf16 %v4314_v32  ;;  %v4315_v33 = vunpack.i.l.bf16 %v4314_v32 }
 0xf31   :  { %4016 = vmatmul.mubr.msk.f32.vlgmr.msra.gmra.mrb[30].mxu0 %vm879_vm3, %v2126_v31 }
 0xf32   :  { %v4186_v34 = vpack.c.bf16 %v4316_v30, %v4315_v33  ;;  %4029 = vmatprep.mubr.msk.f32.mxu0 %vm4531_vm1, %v4530_v13 }
 0xf34   :  { %4187 = vmatpush3.bf16.msra.mxu0 %v4186_v34 }
 0xf35   :  { %4188 = vmatprep.subr.bf16.mxu0 %v4545_v54 }
 0xf36   :  { %v4424_v36 = vpop.eup %4423 }
 0xf37   :  { %v2298_v39 = vmul.f32 %v4424_v36, %v4420_v48 }
 0xf39   :  { %4030 = vmatmul.mubr.msk.f32.vlgmr.msra.gmra.mrb[32].mxu0 %vm879_vm3, %v2298_v39 }
 0xf3a   :  { %4036 = vmatprep.mubr.msk.f32.mxu0 %vm4531_vm1, %v4530_v13 }
 0xf3d   :  { %4191 = vmatpush3.bf16.xpose.msk.msra.mxu0 %vm4847_vm5, %v4189_v4 }
 0xf3e   :  { %4199 = vmatprep.subr.bf16.mxu0 %v4545_v54 }
 0xf44   :  { %4037 = vmatmul.mubr.msk.f32.vlgmr.msra.gmra.mrb[34].mxu0 %vm208_vm2, %v2379_v5 }
 0xf45   :  { %4057 = vmatprep.mubr.msk.f32.mxu0 %vm4531_vm1, %v4530_v13 }
0x1004   :  { %v4929_v40 = vpop.f32.mrb[30].mxu0 }
0x1005   :  { %v4017_v41 = vpop.f32.mrb[31].mxu0 }
0x100c   :  { %v4931_v42 = vpop.f32.mrb[32].mxu0 }
0x100d   :  { %v4031_v45 = vpop.f32.mrb[33].mxu0 }
0x1017   :  { %v2456_v18 = vpop.f32.mrb[34].mxu0 }
0x1018   :  { %v4038_v46 = vpop.f32.mrb[35].mxu0  ;;  %v2460_v47 = vsel %vm879_vm3, %v2456_v18, -inf }
0x1019   :  { %2461 = vmax.xlane.f32.xlu0 %v2460_v47 }
0x102f   :  { %4323 = vrot.lane.b32.xlu0 %v4871_v28, %s4540_s14 }
0x10a6   :  { %v2462_v49 = vpop.xlane.xlu0 %2461 }
0x10a7   :  { %v2463_v50 = vsub.f32 %v2456_v18, %v2462_v49 }
0x10a9   :  { %v2464_v51 = vmul.f32 1.442695, %v2463_v50 }
0x10aa   :  { %v4324_v52 = vpop.permute.xlu0 %4323 }
0x10ab   :  { %4425 = vpow2.f32 %v2464_v51  ;;  %v4326_v1 = vunpack.i.h.bf16 %v4324_v52  ;;  %v4325_v55 = vunpack.i.l.bf16 %v4324_v52 }
0x10ad   :  { %v4193_v57 = vpack.c.bf16 %v4326_v1, %v4325_v55 }
0x10af   :  { %4194 = vmatpush3.bf16.msra.mxu1 %v4193_v57 }
0x10b0   :  { %4195 = vmatprep.subr.bf16.mxu1 %v4545_v54 }
0x10b5   :  { %v4426_v14 = vpop.eup %4425 }
0x10b6   :  { %v2466_v58 = vsel %vm879_vm3, %v4426_v14, 0.0 }
0x10b7   :  { %2467 = vadd.xlane.f32.xlu1 %v2466_v58 }
0x10c8   :  { %4328 = vrot.lane.b32.xlu1 %v4867_v0, %s4529_s6 }
0x1144   :  { %v2468_v59 = vpop.xlane.xlu1 %2467 }
0x1145   :  { %4427 = vrcp.f32 %v2468_v59 }
0x1148   :  { %v4329_v28 = vpop.permute.xlu1 %4328 }
0x1149   :  { %v4331_v60 = vunpack.i.h.bf16 %v4329_v28  ;;  %v4330_v61 = vunpack.i.l.bf16 %v4329_v28 }
0x114b   :  { %v4196_v2 = vpack.c.bf16 %v4331_v60, %v4330_v61 }
0x114f   :  { %v4428_v62 = vpop.eup %4427 }
0x1150   :  { %v2470_v63 = vmul.f32 %v4428_v62, %v4426_v14 }
0x1152   :  { %4044 = vmatmul.mubr.msk.f32.vlgmr.msra.gmra.mrb[26].mxu1 %vm879_vm3, %v2470_v63 }
0x1153   :  { %4198 = vmatpush3.bf16.xpose.msk.msra.mxu1 %vm4847_vm5, %v4196_v2  ;;  %4050 = vmatprep.mubr.msk.f32.mxu1 %vm4531_vm1, %v4530_v13 }
0x1154   :  { %4206 = vmatprep.subr.bf16.mxu1 %v4545_v54 }
0x115a   :  { %4051 = vmatmul.mubr.msk.f32.vlgmr.msra.gmra.mrb[28].mxu1 %vm208_vm2, %v4948_v3 }
0x115b   :  { %4071 = vmatprep.mubr.msk.f32.mxu1 %vm4531_vm1, %v4530_v13 }
0x1225   :  { %v4954_v7 = vpop.f32.mrb[26].mxu1 }
0x1226   :  { %v4045_v6 = vpop.f32.mrb[27].mxu1 }
0x122d   :  { %v2644_v8 = vpop.f32.mrb[28].mxu1 }
0x122e   :  { %v4052_v12 = vpop.f32.mrb[29].mxu1  ;;  %v2648_v16 = vsel %vm879_vm3, %v2644_v8, -inf }
0x122f   :  { %2649 = vmax.xlane.f32.xlu0 %v2648_v16 }
0x1245   :  { %4333 = vrot.lane.b32.xlu0 %v4865_v10, %s4538_s12 }
0x1249   :  { %2740 = vrot.lane.b32.xlu0 %v4948_v3, %s4533_s7 }
0x12bc   :  { %v2650_v11 = vpop.xlane.xlu0 %2649 }
0x12bd   :  { %v2651_v17 = vsub.f32 %v2644_v8, %v2650_v11 }
0x12bf   :  { %v2652_v19 = vmul.f32 1.442695, %v2651_v17 }
0x12c0   :  { %v4334_v20 = vpop.permute.xlu0 %4333 }
0x12c1   :  { %4429 = vpow2.f32 %v2652_v19  ;;  %v4336_v48 = vunpack.i.h.bf16 %v4334_v20  ;;  %v4335_v15 = vunpack.i.l.bf16 %v4334_v20 }
0x12c3   :  { %v4200_v24 = vpack.c.bf16 %v4336_v48, %v4335_v15 }
0x12c4   :  { %v2741_v37 = vpop.permute.xlu0 %2740 }
0x12c5   :  { %4201 = vmatpush3.bf16.msra.mxu0 %v4200_v24 }
0x12c6   :  { %4202 = vmatprep.subr.bf16.mxu0 %v4545_v54 }
0x12cb   :  { %v4430_v27 = vpop.eup %4429 }
0x12cc   :  { %v2654_v29 = vsel %vm879_vm3, %v4430_v27, 0.0 }
0x12cd   :  { %2655 = vadd.xlane.f32.xlu1 %v2654_v29 }
0x12de   :  { %4338 = vrot.lane.b32.xlu1 %v4867_v0, %s4532_s1 }
0x135a   :  { %v2656_v31 = vpop.xlane.xlu1 %2655 }
0x135b   :  { %4431 = vrcp.f32 %v2656_v31 }
0x135e   :  { %v4339_v32 = vpop.permute.xlu1 %4338 }
0x135f   :  { %v4341_v30 = vunpack.i.h.bf16 %v4339_v32  ;;  %v4340_v33 = vunpack.i.l.bf16 %v4339_v32 }
0x1361   :  { %v4203_v36 = vpack.c.bf16 %v4341_v30, %v4340_v33 }
0x1365   :  { %v4432_v34 = vpop.eup %4431 }
0x1366   :  { %v2658_v35 = vmul.f32 %v4432_v34, %v4430_v27 }
0x1368   :  { %4058 = vmatmul.mubr.msk.f32.vlgmr.msra.gmra.mrb[36].mxu0 %vm879_vm3, %v2658_v35 }
0x1369   :  { %4205 = vmatpush3.bf16.xpose.msk.msra.mxu0 %vm4847_vm5, %v4203_v36  ;;  %4064 = vmatprep.mubr.msk.f32.mxu0 %vm4531_vm1, %v4530_v13 }
0x136a   :  { %4213 = vmatprep.subr.bf16.mxu0 %v4545_v54 }
0x1370   :  { %4065 = vmatmul.mubr.msk.f32.vlgmr.msra.gmra.mrb[38].mxu0 %vm208_vm2, %v2741_v37 }
0x1371   :  { %4085 = vmatprep.mubr.msk.f32.mxu0 %vm4531_vm1, %v4530_v13 }
0x143b   :  { %v4974_v38 = vpop.f32.mrb[36].mxu0 }
0x143c   :  { %v4059_v39 = vpop.f32.mrb[37].mxu0 }
0x143d   :  { %v4367_v39 = vpack.i.bf16 %v4793_v22, %v4791_v21 }
0x1443   :  { %v2818_v4 = vpop.f32.mrb[38].mxu0 }
0x1444   :  { %v4066_v5 = vpop.f32.mrb[39].mxu0  ;;  %v2822_v41 = vsel %vm879_vm3, %v2818_v4, -inf }
0x1445   :  { %2823 = vmax.xlane.f32.xlu1 %v2822_v41 }
0x1456   :  { %4348 = vrot.lane.b32.xlu1 %v4867_v0, %s4536_s10 }
0x145a   :  { %2912 = vrot.lane.b32.xlu1 %v4948_v3, %s4534_s8 }
0x14d2   :  { %v2824_v45 = vpop.xlane.xlu1 %2823 }
0x14d3   :  { %v2825_v18 = vsub.f32 %v2818_v4, %v2824_v45 }
0x14d5   :  { %v2826_v46 = vmul.f32 1.442695, %v2825_v18 }
0x14d6   :  { %v4349_v57 = vpop.permute.xlu1 %4348 }
0x14d7   :  { %4433 = vpow2.f32 %v2826_v46  ;;  %v4351_v58 = vunpack.i.h.bf16 %v4349_v57  ;;  %v4350_v59 = vunpack.i.l.bf16 %v4349_v57 }
0x14d9   :  { %v4210_v60 = vpack.c.bf16 %v4351_v58, %v4350_v59 }
0x14da   :  { %v2913_v61 = vpop.permute.xlu1 %2912 }
0x14e1   :  { %v4434_v47 = vpop.eup %4433 }
0x14e2   :  { %v2828_v49 = vsel %vm879_vm3, %v4434_v47, 0.0 }
0x14e3   :  { %2829 = vadd.xlane.f32.xlu0 %v2828_v49 }
0x14f9   :  { %4343 = vrot.lane.b32.xlu0 %v4865_v10, %s4541_s15 }
0x1570   :  { %v2830_v50 = vpop.xlane.xlu0 %2829 }
0x1571   :  { %4435 = vrcp.f32 %v2830_v50 }
0x1574   :  { %v4344_v51 = vpop.permute.xlu0 %4343 }
0x1575   :  { %v4346_v52 = vunpack.i.h.bf16 %v4344_v51  ;;  %v4345_v1 = vunpack.i.l.bf16 %v4344_v51 }
0x1577   :  { %v4207_v55 = vpack.c.bf16 %v4346_v52, %v4345_v1 }
0x1579   :  { %4208 = vmatpush3.bf16.msra.mxu1 %v4207_v55 }
0x157a   :  { %4209 = vmatprep.subr.bf16.mxu1 %v4545_v54 }
0x157b   :  { %v4436_v14 = vpop.eup %4435 }
0x157c   :  { %v2832_v28 = vmul.f32 %v4436_v14, %v4434_v47 }
0x157e   :  { %4072 = vmatmul.mubr.msk.f32.vlgmr.msra.gmra.mrb[30].mxu1 %vm879_vm3, %v2832_v28 }
0x157f   :  { %4078 = vmatprep.mubr.msk.f32.mxu1 %vm4531_vm1, %v4530_v13 }
0x1582   :  { %4212 = vmatpush3.bf16.xpose.msk.msra.mxu1 %vm4847_vm5, %v4210_v60 }
0x1583   :  { %4220 = vmatprep.subr.bf16.mxu1 %v4545_v54 }
0x1589   :  { %4079 = vmatmul.mubr.msk.f32.vlgmr.msra.gmra.mrb[32].mxu1 %vm208_vm2, %v2913_v61 }
0x158a   :  { %4099 = vmatprep.mubr.msk.f32.mxu1 %vm4531_vm1, %v4530_v13 }
0x1651   :  { %v2908_v62 = vpop.f32.mrb[30].mxu1 }
0x1652   :  { %v4073_v63 = vpop.f32.mrb[31].mxu1 }
0x165c   :  { %v2990_v2 = vpop.f32.mrb[32].mxu1 }
0x165d   :  { %v4080_v6 = vpop.f32.mrb[33].mxu1  ;;  %v2994_v8 = vsel %vm879_vm3, %v2990_v2, -inf }
0x165e   :  { %2995 = vmax.xlane.f32.xlu0 %v2994_v8 }
0x1674   :  { %4353 = vrot.lane.b32.xlu0 %v4865_v10, %s4539_s13 }
0x1678   :  { %3084 = vrot.lane.b32.xlu0 %v4948_v3, %s4535_s9 }
0x16eb   :  { %v2996_v12 = vpop.xlane.xlu0 %2995 }
0x16ec   :  { %v2997_v16 = vsub.f32 %v2990_v2, %v2996_v12 }
0x16ee   :  { %v2998_v11 = vmul.f32 1.442695, %v2997_v16 }
0x16ef   :  { %v4354_v17 = vpop.permute.xlu0 %4353 }
0x16f0   :  { %4437 = vpow2.f32 %v2998_v11  ;;  %v4356_v19 = vunpack.i.h.bf16 %v4354_v17  ;;  %v4355_v20 = vunpack.i.l.bf16 %v4354_v17 }
0x16f2   :  { %v4214_v48 = vpack.c.bf16 %v4356_v19, %v4355_v20 }
0x16f4   :  { %4215 = vmatpush3.bf16.msra.mxu0 %v4214_v48 }
0x16f5   :  { %4216 = vmatprep.subr.bf16.mxu0 %v4545_v54  ;;  %v3085_v54 = vpop.permute.xlu0 %3084 }
0x16fa   :  { %v4438_v15 = vpop.eup %4437 }
0x16fb   :  { %v3000_v24 = vsel %vm879_vm3, %v4438_v15, 0.0 }
0x16fc   :  { %3001 = vadd.xlane.f32.xlu1 %v3000_v24 }
0x170d   :  { %4358 = vrot.lane.b32.xlu1 %v4867_v0, %s4537_s11 }
0x1789   :  { %v3002_v27 = vpop.xlane.xlu1 %3001 }
0x178a   :  { %4439 = vrcp.f32 %v3002_v27 }
0x178d   :  { %v4359_v3 = vpop.permute.xlu1 %4358 }
0x178e   :  { %v4361_v29 = vunpack.i.h.bf16 %v4359_v3  ;;  %v4360_v31 = vunpack.i.l.bf16 %v4359_v3 }
0x1790   :  { %v4217_v33 = vpack.c.bf16 %v4361_v29, %v4360_v31 }
0x1794   :  { %v4440_v32 = vpop.eup %4439 }
0x1795   :  { %v3004_v30 = vmul.f32 %v4440_v32, %v4438_v15 }
0x1797   :  { %4086 = vmatmul.mubr.msk.f32.vlgmr.msra.gmra.mrb[40].mxu0 %vm879_vm3, %v3004_v30  ;;  %v48_v30 = vld [vmem:[#allocation5 + $0x40] sm:$0xff] }
0x1798   :  { %4219 = vmatpush3.bf16.xpose.msk.msra.mxu0 %vm4847_vm5, %v4217_v33  ;;  %4092 = vmatprep.mubr.msk.f32.mxu0 %vm4531_vm1, %v4530_v13  ;;  %v49_v33 = vld [vmem:[#allocation5 + $0x48] sm:$0xff] }
0x179f   :  { %4093 = vmatmul.mubr.msk.f32.vlgmr.msra.gmra.mrb[42].mxu0 %vm208_vm2, %v3085_v54  ;;  %v4231_v54 = vpack.c.bf16 %v49_v33, %v48_v30 }
0x17a1   :  { %4232 = vmatprep.subr.bf16.mxu0 %v4231_v54 }
0x17a2   :  { %4234 = vmatpush3.bf16.msra.mxu0 %v4231_v54 }
0x186a   :  { %v3080_v0 = vpop.f32.mrb[40].mxu0 }
0x186b   :  { %v4087_v34 = vpop.f32.mrb[41].mxu0 }
0x186c   :  { %v51_v34 = vld [vmem:[#allocation5 + $0x58] sm:$0xff] }
0x1872   :  { %v3162_v35 = vpop.f32.mrb[42].mxu0 }
0x1873   :  { %v4094_v36 = vpop.f32.mrb[43].mxu0  ;;  %v3166_v37 = vsel %vm879_vm3, %v3162_v35, -inf }
0x1874   :  { %3167 = vmax.xlane.f32.xlu1 %v3166_v37  ;;  %v52_v36 = vld [vmem:[#allocation5 + $0x60] sm:$0xff]  ;;  %v53_v37 = vld [vmem:[#allocation5 + $0x68] sm:$0xff] }
0x1885   :  { %4368 = vrot.lane.b32.xlu1 %v4367_v39, %s4542_s16  ;;  %v54_v39 = vld [vmem:[#allocation5 + $0x70] sm:$0xff] }
0x1889   :  { %4373 = vrot.lane.b32.xlu1 %v4372_v9, %s4542_s16  ;;  %v4239_v9 = vpack.c.bf16 %v53_v37, %v52_v36 }
0x188d   :  { %2555 = vrot.lane.b32.xlu1 %v4931_v42, %s4543_s17 }
0x1891   :  { %2559 = vrot.lane.b32.xlu1 %v4954_v7, %s4544_s18 }
0x1901   :  { %v3168_v13 = vpop.xlane.xlu1 %3167 }
0x1902   :  { %v3169_v4 = vsub.f32 %v3162_v35, %v3168_v13  ;;  %v55_v13 = vld [vmem:[#allocation5 + $0x78] sm:$0xff] }
0x1904   :  { %v3170_v5 = vmul.f32 1.442695, %v3169_v4  ;;  %v4243_v4 = vpack.c.bf16 %v55_v13, %v54_v39 }
0x1905   :  { %v4369_v22 = vpop.permute.xlu1 %4368 }
0x1906   :  { %4441 = vpow2.f32 %v3170_v5  ;;  %v4371_v42 = vunpack.i.h.bf16 %v4369_v22  ;;  %v4370_v7 = vunpack.i.l.bf16 %v4369_v22  ;;  %v56_v5 = vld [vmem:[#allocation5 + $0x80] sm:$0xff] }
0x1909   :  { %v4374_v26 = vpop.permute.xlu1 %4373 }
0x190a   :  { %v4375_v50 = vunpack.i.l.bf16 %v4374_v26 }
0x190d   :  { %v2556_v47 = vpop.permute.xlu1 %2555 }
0x1910   :  { %v4442_v41 = vpop.eup %4441 }
0x1911   :  { %v3172_v21 = vsel %vm879_vm3, %v4442_v41, 0.0  ;;  %v2560_v14 = vpop.permute.xlu1 %2559 }
0x1912   :  { %3173 = vadd.xlane.f32.xlu0 %v3172_v21 }
0x1928   :  { %4363 = vrot.lane.b32.xlu0 %v4865_v10, %s4540_s14  ;;  %v4223_v10 = vpack.c.bf16 %v4371_v42, %v4370_v7 }
0x192c   :  { %2551 = vrot.lane.b32.xlu0 %v4929_v40, %s4527_s20  ;;  %v4376_v40 = vunpack.i.h.bf16 %v4374_v26 }
0x192e   :  { %v4227_v55 = vpack.c.bf16 %v4376_v40, %v4375_v50 }
0x1930   :  { %3257 = vrot.lane.b32.xlu0 %v2908_v62, %s4527_s20  ;;  %s3639_s20 = sshll.u32 %s4546_s19, 4  ;;  %s3640_s20 = int_to_ptr.vmem [resolvable:$true] %s3639_s20 }
0x1931   :  { %s4497_s21 = scalar_lea.vmem %s3640_s20, 128  ;;  %p4502_p3 = scmp.lt.s32.totalorder %s3640_s20, %s3640_s20 }
0x1932   :  { %p4498_p2 = scmp.ne.s32.totalorder %s3640_s20, %s4497_s21  ;;  %p4503_p4 = scmp.lt.s32.totalorder %s4497_s21, %s4497_s21 }
0x1934   :  { %3261 = vrot.lane.b32.xlu0 %v3080_v0, %s4543_s17  ;;  %v50_v0 = vld [vmem:[#allocation5 + $0x50] sm:$0xff]  ;;  %p4504_p5 = por %p4503_p4, %p4502_p3 }
0x1935   :  { %v4235_v35 = vpack.c.bf16 %v51_v34, %v50_v0 }
0x1936   :  { %p4505_p6 = pnand %p4504_p5, %p4498_p2 }
0x1937   :  { %4236 = vmatprep.subr.bf16.mxu0 %v4235_v35 }
0x1938   :  { %3371 = vrot.lane.b32.xlu0 %v4837_v56, %s4542_s16  ;;  %4238 = vmatpush3.bf16.msra.mxu0 %v4235_v35 }
0x199f   :  { %v3174_v25 = vpop.xlane.xlu0 %3173 }
0x19a0   :  { %4443 = vrcp.f32 %v3174_v25 }
0x19a3   :  { %v4364_v45 = vpop.permute.xlu0 %4363 }
0x19a4   :  { %v4366_v18 = vunpack.i.h.bf16 %v4364_v45  ;;  %v4365_v46 = vunpack.i.l.bf16 %v4364_v45 }
0x19a6   :  { %v4221_v49 = vpack.c.bf16 %v4366_v18, %v4365_v46 }
0x19a7   :  { %v2552_v51 = vpop.permute.xlu0 %2551 }
0x19a8   :  { %v2562_v52 = vsel %vm208_vm2, %v4901_v53, %v2552_v51  ;;  %4222 = vmatpush3.bf16.msra.mxu1 %v4221_v49 }
0x19a9   :  { %4224 = vmatprep.subr.bf16.mxu1 %v4223_v10  ;;  %v2563_v1 = vsel %vm879_vm3, %v2562_v52, %v2556_v47 }
0x19aa   :  { %v4444_v56 = vpop.eup %4443  ;;  %v2564_v58 = vsel %vm881_vm4, %v2563_v1, %v2560_v14  ;;  %v58_v1 = vld [vmem:[#allocation5 + $0x90] sm:$0xff] }
0x19ab   :  { %v3176_v57 = vmul.f32 %v4444_v56, %v4442_v41  ;;  %v3258_v28 = vpop.permute.xlu0 %3257  ;;  %v57_v41 = vld [vmem:[#allocation5 + $0x88] sm:$0xff]  ;;  %v3726_v56 = vld [vmem:[#allocation5 + $0xa2] ss:$0 sm:$0xff] }
0x19ac   :  { %v3268_v61 = vsel %vm208_vm2, %v4974_v38, %v3258_v28  ;;  %v4247_v21 = vpack.c.bf16 %v57_v41, %v56_v5 }
0x19ad   :  { %4100 = vmatmul.mubr.msk.f32.vlgmr.msra.gmra.mrb[34].mxu1 %vm879_vm3, %v3176_v57 }
0x19ae   :  { %4110 = vmatprep.mubr.msk.f32.mxu1 %vm101_vm0, %v2564_v58  ;;  %4226 = vmatpush3.bf16.msra.mxu1 %v4223_v10 }
0x19af   :  { %4228 = vmatprep.subr.bf16.mxu1 %v4227_v55  ;;  %v3262_v60 = vpop.permute.xlu0 %3261 }
0x19b0   :  { %v3269_v62 = vsel %vm879_vm3, %v3268_v61, %v3262_v60 }
0x19b2   :  { %4230 = vmatpush3.bf16.msra.mxu1 %v4227_v55  ;;  %v59_v55 = vld [vmem:[#allocation5 + $0x98] sm:$0xff] }
0x19b3   :  { %v3372_v8 = vpop.permute.xlu0 %3371  ;;  %4240 = vmatprep.subr.bf16.mxu1 %v4239_v9  ;;  %v4251_v57 = vpack.c.bf16 %v59_v55, %v58_v1 }
0x1a80   :  { %v3252_v59 = vpop.f32.mrb[34].mxu1 }
0x1a81   :  { %3265 = vrot.lane.b32.xlu1 %v3252_v59, %s4544_s18  ;;  %v4101_v53 = vpop.f32.mrb[35].mxu1 }
0x1af3   :  { %v3266_v63 = vpop.permute.xlu1 %3265 }
0x1af4   :  { %v3270_v2 = vsel %vm881_vm4, %v3269_v62, %v3266_v63 }
0x1af5   :  { %4111 = vmatmul.mubr.msk.f32.vlgmr.msra.gmra.mrb[36].mxu1 %vm101_vm0, %v3270_v2 }
0x1af6   :  { %4242 = vmatpush3.bf16.msra.mxu1 %v4239_v9 }
0x1af7   :  { %4244 = vmatprep.subr.bf16.mxu1 %v4243_v4 }
0x1afa   :  { %4246 = vmatpush3.bf16.msra.mxu1 %v4243_v4 }
0x1afb   :  { %4248 = vmatprep.subr.bf16.mxu1 %v4247_v21 }
0x1afe   :  { %4250 = vmatpush3.bf16.msra.mxu1 %v4247_v21 }
0x1aff   :  { %4252 = vmatprep.subr.bf16.mxu1 %v4251_v57 }
0x1b02   :  { %4254 = vmatpush3.bf16.msra.mxu1 %v4251_v57 }
0x1bc8   :  { %v4112_v6 = vpop.f32.mrb[36].mxu1 }
0x1bc9   :  { %v3369_v12 = vadd.f32 %v4112_v6, %v4813_v43  ;;  %v3359_v16 = vpop.f32.mrb[37].mxu1 }
0x1bca   :  { %v3368_v11 = vadd.f32 %v3359_v16, %v4815_v44 }
0x1bcb   :  { %v3375_v17 = vadd.f32 %v3372_v8, %v3369_v12 }
0x1bcc   :  { %v3374_v19 = vadd.f32 %v3372_v8, %v3368_v11 }
0x1bcd   :  { %v3379_v20 = vsel %vm101_vm0, %v3375_v17, 0.0 }
0x1bce   :  { %3380 = vadd.xlane.f32.xlu0 %v3379_v20  ;;  %v3376_v38 = vsel %vm101_vm0, %v3374_v19, 0.0 }
0x1bcf   :  { %3377 = vadd.xlane.f32.xlu1 %v3376_v38 }
0x1c5b   :  { %v3381_v48 = vpop.xlane.xlu0 %3380 }
0x1c5c   :  { %v3383_v15 = vmul.f32 0.03125, %v3381_v48  ;;  %v3378_v24 = vpop.xlane.xlu1 %3377 }
0x1c5d   :  { %v3382_v27 = vmul.f32 0.03125, %v3378_v24 }
0x1c5e   :  { %v3385_v3 = vsub.f32 %v3375_v17, %v3383_v15  ;;  %v3731_v17 = vld [vmem:[#allocation5 + $0xa4] ss:$0 sm:$0xff] }
0x1c5f   :  { %v3384_v29 = vsub.f32 %v3374_v19, %v3382_v27 }
0x1c60   :  { %v3387_v31 = vmul.f32 %v3385_v3, %v3385_v3 }
0x1c61   :  { %v3386_v32 = vmul.f32 %v3384_v29, %v3384_v29 }
0x1c62   :  { %v3391_v43 = vsel %vm101_vm0, %v3387_v31, 0.0 }
0x1c63   :  { %3392 = vadd.xlane.f32.xlu1 %v3391_v43  ;;  %v3388_v44 = vsel %vm101_vm0, %v3386_v32, 0.0 }
0x1c64   :  { %3389 = vadd.xlane.f32.xlu0 %v3388_v44 }
0x1c74   :  { %3407 = vrot.lane.b32.xlu1 %v4795_v23, %s4542_s16 }
0x1c78   :  { %3584 = vrot.lane.b32.xlu1 %v3726_v56, %s4538_s12 }
0x1c7a   :  { %3402 = vrot.lane.b32.xlu0 %v4795_v23, %s4538_s12 }
0x1cf0   :  { %v3393_v23 = vpop.xlane.xlu1 %3392 }
0x1cf1   :  { %v3395_v22 = vmul.f32 0.03125, %v3393_v23  ;;  %v3390_v25 = vpop.xlane.xlu0 %3389 }
0x1cf2   :  { %v3394_v26 = vmul.f32 0.03125, %v3390_v25 }
0x1cf3   :  { %v3397_v42 = vadd.f32 1e-05, %v3395_v22 }
0x1cf4   :  { %v3396_v7 = vadd.f32 1e-05, %v3394_v26  ;;  %v3408_v40 = vpop.permute.xlu1 %3407 }
0x1cf5   :  { %4445 = vrsqrt.f32 %v3397_v42  ;;  %v3403_v18 = vpop.permute.xlu0 %3402 }
0x1cf6   :  { %4447 = vrsqrt.f32 %v3396_v7 }
0x1cf8   :  { %v3585_v62 = vpop.permute.xlu1 %3584 }
0x1cff   :  { %v4446_v45 = vpop.eup %4445 }
0x1d00   :  { %v4448_v46 = vpop.eup %4447  ;;  %v3401_v10 = vmul.f32 %v4446_v45, %v3385_v3 }
0x1d01   :  { %v3400_v47 = vmul.f32 %v4448_v46, %v3384_v29 }
0x1d02   :  { %v3406_v49 = vmul.f32 %v3403_v18, %v3401_v10 }
0x1d03   :  { %v3405_v50 = vmul.f32 %v3403_v18, %v3400_v47 }
0x1d04   :  { %v3411_v52 = vadd.f32 %v3408_v40, %v3406_v49 }
0x1d05   :  { %v3410_v51 = vadd.f32 %v3408_v40, %v3405_v50 }
0x1d07   :  { %4121 = vmatprep.mubr.msk.f32.mxu0 %vm101_vm0, %v3410_v51 }
0x1d08   :  { %4122 = vmatmul.mubr.msk.f32.vlgmr.msra.gmra.mrb[44].mxu0 %vm101_vm0, %v3411_v52 }
0x1ddb   :  { %v4123_v14 = vpop.f32.mrb[44].mxu0 }
0x1ddc   :  { %v3494_v58 = vadd.f32 %v4123_v14, %v3726_v56  ;;  %v3488_v59 = vpop.f32.mrb[45].mxu0 }
0x1ddd   :  { %v3489_v53 = vadd.f32 %v3726_v56, %v3488_v59 }
0x1dde   :  { %v3498_v60 = vmax.f32 %v3494_v58, 0.0 }
0x1ddf   :  { %v3497_v28 = vmax.f32 %v3489_v53, 0.0 }
0x1de1   :  { %4140 = vmatprep.mubr.msk.f32.mxu1 %vm3499_vm6, %v3497_v28 }
0x1de2   :  { %4141 = vmatmul.mubr.msk.f32.vlgmr.msra.gmra.mrb[38].mxu1 %vm3499_vm6, %v3498_v60 }
0x1eb5   :  { %v4142_v61 = vpop.f32.mrb[38].mxu1 }
0x1eb6   :  { %v3582_v63 = vadd.f32 %v4142_v61, %v3411_v52  ;;  %v3572_v2 = vpop.f32.mrb[39].mxu1 }
0x1eb7   :  { %v3581_v6 = vadd.f32 %v3572_v2, %v3410_v51 }
0x1eb8   :  { %v3588_v8 = vadd.f32 %v3585_v62, %v3582_v63 }
0x1eb9   :  { %v3587_v12 = vadd.f32 %v3585_v62, %v3581_v6 }
0x1eba   :  { %v3592_v16 = vsel %vm101_vm0, %v3588_v8, 0.0 }
0x1ebb   :  { %3593 = vadd.xlane.f32.xlu0 %v3592_v16  ;;  %v3589_v11 = vsel %vm101_vm0, %v3587_v12, 0.0 }
0x1ebc   :  { %3590 = vadd.xlane.f32.xlu1 %v3589_v11 }
0x1ecd   :  { %3622 = vrot.lane.b32.xlu1 %v3731_v17, %s4529_s6 }
0x1f48   :  { %v3594_v19 = vpop.xlane.xlu0 %3593 }
0x1f49   :  { %v3596_v20 = vmul.f32 0.03125, %v3594_v19  ;;  %v3591_v38 = vpop.xlane.xlu1 %3590 }
0x1f4a   :  { %v3595_v48 = vmul.f32 0.03125, %v3591_v38 }
0x1f4b   :  { %v3598_v15 = vsub.f32 %v3588_v8, %v3596_v20 }
0x1f4c   :  { %v3597_v24 = vsub.f32 %v3587_v12, %v3595_v48 }
0x1f4d   :  { %v3600_v29 = vmul.f32 %v3598_v15, %v3598_v15  ;;  %v3623_v35 = vpop.permute.xlu1 %3622 }
0x1f4e   :  { %v3599_v27 = vmul.f32 %v3597_v24, %v3597_v24 }
0x1f4f   :  { %v3604_v31 = vsel %vm101_vm0, %v3600_v29, 0.0 }
0x1f50   :  { %v3601_v3 = vsel %vm101_vm0, %v3599_v27, 0.0 }
0x1f51   :  { %3602 = vadd.xlane.f32.xlu0 %v3601_v3 }
0x1f55   :  { %3605 = vadd.xlane.f32.xlu0 %v3604_v31 }
0x1fde   :  { %v3603_v32 = vpop.xlane.xlu0 %3602 }
0x1fdf   :  { %v3607_v43 = vmul.f32 0.03125, %v3603_v32 }
0x1fe1   :  { %v3609_v44 = vadd.f32 1e-05, %v3607_v43 }
0x1fe2   :  { %v3606_v30 = vpop.xlane.xlu0 %3605 }
0x1fe3   :  { %4449 = vrsqrt.f32 %v3609_v44  ;;  %v3608_v33 = vmul.f32 0.03125, %v3606_v30 }
0x1fe5   :  { %v3610_v54 = vadd.f32 1e-05, %v3608_v33 }
0x1fe7   :  { %4451 = vrsqrt.f32 %v3610_v54 }
0x1fed   :  { %v4450_v0 = vpop.eup %4449 }
0x1fee   :  { %v3613_v34 = vmul.f32 %v4450_v0, %v3597_v24 }
0x1ff0   :  { %v3619_v36 = vmul.f32 %v3731_v17, %v3613_v34 }
0x1ff1   :  { %v4452_v37 = vpop.eup %4451 }
0x1ff2   :  { %v3614_v39 = vmul.f32 %v4452_v37, %v3598_v15  ;;  %v3625_v9 = vadd.f32 %v3623_v35, %v3619_v36 }
0x1ff4   :  { %v3620_v13 = vmul.f32 %v3731_v17, %v3614_v39 }
0x1ff6   :  { %v3626_v4 = vadd.f32 %v3623_v35, %v3620_v13 }
0x1ff8   :  { %3628 = vrot.lane.b32.xlu0 %v3626_v4, %s4542_s16 }
0x206a   :  { %v3629_v5 = vpop.permute.xlu0 %3628 }
0x206b   :  { %v3631_v41 = vsel %vm101_vm0, %v3625_v9, %v3629_v5 }
0x206c   :  { %3632 = vst.msk [vmem:[#allocation7] sm:$0xff] %vm3499_vm6, %v3631_v41 }
0x206d   :  { %4508 = shalt.err (!%p4505_p6)
}
0x206e   :  { %s4509_s24 = scalar_lea.hbm %s5078_s2, 128 }
0x206f   :  { %p4510_p7 = scmp.ne.s32.totalorder %s5078_s2, %s4509_s24  ;;  %p4513_p8 = scmp.lt.u32.totalorder %s4509_s24, %s5078_s2 }
0x2071   :  { %p4515_p9 = pnand %p4513_p8, %p4510_p7 }
0x2073   :  { %4518 = shalt.err (!%p4515_p9)
}
0x2074   :  { %3642 = dma.vmem_to_hbm [thread:$0]  %s3640_s20, 128, %s5078_s2, [#allocation4]  }
0x2075   :  { %4523 = dma.done.wait [#allocation4], 128  }
0x2076   :  { %4524 = vsyncadd [#allocation4], 4294967168 }
0x2077   :  { %3646 = vsyncpa [#allocation3], 1 }
0x2078   :  { %3647 = vsyncpa [#allocation6], 1 }
0x2079   :  { %3648 = vsyncpa [#allocation4], 1 }

</bundles_post_ra>
